<compile_context>
chip_gen: v5e
topology: v5e:2x2
jax: 0.10.0
libtpu: 0.0.40
codegen_flags: <defaults>
</compile_context>

<pallas_src>
import jax
import jax.numpy as jnp
from jax.experimental import pallas as pl
from jax.experimental.pallas import tpu as pltpu

LANE = 128
MIB = 2 ** 20


def _round_up(x: int, m: int) -> int:
    return (x + m - 1) // m * m


def _pad2d(a, rows: int, cols: int, dtype=None):
    out = jnp.pad(a, ((0, rows - a.shape[0]), (0, cols - a.shape[1])))
    return out.astype(dtype) if dtype is not None else out


# ----------------------------- fused Pallas kernel ---------------------------
def fused_gcn_kernel(a_ref, x_ref, w0_ref, b0_ref, w_ref, b_ref, o_ref):
    """One grid step == one GCN layer.

    A_hat / X / W0 stay VMEM-resident across the whole grid (constant block
    index); the running hidden state is the VMEM-resident output block itself
    (constant output index map), so no separate scratch is needed.
    """
    layer = pl.program_id(0)
    last = pl.num_programs(0) - 1

    def layer_step(h_bf16, w_bf16, b_f32):
        # Feature transform on the MXU: bf16 operands, f32 accumulation.
        xw = jnp.dot(h_bf16, w_bf16, preferred_element_type=jnp.float32)
        # Message passing on the MXU: A_hat @ (H W), plus f32 bias.
        h = jnp.dot(a_ref[...], xw.astype(jnp.bfloat16),
                    preferred_element_type=jnp.float32) + b_f32

        # Hidden state fed to the next layer gets ReLU; the final layer
        # (jk='last' with out_channels) skips it entirely.
        @pl.when(layer != last)
        def _():
            o_ref[...] = jnp.maximum(h, 0.0)

        @pl.when(layer == last)
        def _():
            o_ref[...] = h

    @pl.when(layer == 0)
    def _():
        layer_step(x_ref[...], w0_ref[...], b0_ref[...])

    @pl.when(layer != 0)
    def _():
        layer_step(o_ref[...].astype(jnp.bfloat16), w_ref[0], b_ref[0])


def _vmem_budget_bytes() -> int:
    """Generation-aware VMEM budget (leave headroom for compiler scratch)."""
    try:
        cap = pltpu.get_tpu_info().vmem_capacity_bytes
    except Exception:
        cap = 128 * MIB
    if cap >= 96 * MIB:          # v5e / v6e: 128 MiB physical VMEM
        return 100 * MIB
    return 48 * MIB              # v7x-class: 64 MiB physical, keep headroom


def fused_gcn_stack(a_pad, x_pad, w0, b0, w_stack, b_stack, *, single_buffer=True):
    """Single pallas_call running all layers; returns padded (N_pad, C_pad) f32."""
    n_pad = a_pad.shape[0]
    c_in_pad = x_pad.shape[1]
    num_layers = w_stack.shape[0]      # stack has a dummy entry at index 0
    c_pad = w_stack.shape[2]

    def spec(shape, index_map, bufs=None):
        if bufs is None:
            return pl.BlockSpec(shape, index_map)
        return pl.BlockSpec(shape, index_map, pipeline_mode=pl.Buffered(bufs))

    big = 1 if single_buffer else None   # single-buffer the grid-invariant blocks

    grid_spec = pltpu.PrefetchScalarGridSpec(
        num_scalar_prefetch=0,
        grid=(num_layers,),
        in_specs=[
            spec((n_pad, n_pad), lambda l: (0, 0), big),        # A_hat (bf16, one DMA)
            spec((n_pad, c_in_pad), lambda l: (0, 0), big),     # X     (bf16, one DMA)
            spec((c_in_pad, c_pad), lambda l: (0, 0)),          # W_0   (bf16)
            spec((1, c_pad), lambda l: (0, 0)),                 # b_0   (f32)
            spec((1, c_pad, c_pad), lambda l: (l, 0, 0)),       # W_l   (bf16, l >= 1)
            spec((1, 1, c_pad), lambda l: (l, 0, 0)),           # b_l   (f32, l >= 1)
        ],
        out_specs=spec((n_pad, c_pad), lambda l: (0, 0), big),  # out == hidden state
    )

    # VMEM accounting that matches the pipeline's actual buffer counts.
    nbig = 1 if single_buffer else 2
    vmem_needed = (
        nbig * n_pad * n_pad * 2          # A_hat bf16
        + nbig * n_pad * c_in_pad * 2     # X bf16
        + nbig * n_pad * c_pad * 4        # out / hidden f32
        + 2 * c_in_pad * c_pad * 2        # W0 bf16 (default double-buffered)
        + 2 * c_pad * 4                   # b0 f32
        + 2 * c_pad * c_pad * 2           # per-layer W bf16
        + 2 * c_pad * 4                   # per-layer b f32
    )
    vmem_limit = int(min(_vmem_budget_bytes(),
                         max(32 * MIB, vmem_needed * 5 // 4 + MIB)))

    flops = (2 * n_pad * c_in_pad * c_pad + 2 * n_pad * n_pad * c_pad
             + (num_layers - 1) * (2 * n_pad * c_pad * c_pad
                                   + 2 * n_pad * n_pad * c_pad))
    bytes_accessed = (2 * n_pad * n_pad + 2 * n_pad * c_in_pad
                      + 4 * n_pad * c_pad + 2 * c_in_pad * c_pad
                      + num_layers * (2 * c_pad * c_pad + 8 * c_pad))

    return pl.pallas_call(
        fused_gcn_kernel,
        out_shape=jax.ShapeDtypeStruct((n_pad, c_pad), jnp.float32),
        grid_spec=grid_spec,
        compiler_params=pltpu.CompilerParams(
            dimension_semantics=("arbitrary",),   # layers are strictly sequential
            vmem_limit_bytes=vmem_limit),
        cost_estimate=pl.CostEstimate(
            flops=flops, transcendentals=0, bytes_accessed=bytes_accessed),
    )(a_pad, x_pad, w0, b0, w_stack, b_stack)


# --------------------------- model glue (JAX side) ---------------------------
def make_params(key, in_channels, hidden_channels, out_channels, num_layers):
    """Glorot-uniform-ish init matching BasicGNN layer shapes."""
    dims = [in_channels] + [hidden_channels] * (num_layers - 1) + [out_channels]
    params = []
    for i in range(num_layers):
        key, kw = jax.random.split(key)
        fan_in, fan_out = dims[i], dims[i + 1]
        limit = (6.0 / (fan_in + fan_out)) ** 0.5
        w = jax.random.uniform(kw, (fan_in, fan_out), jnp.float32, -limit, limit)
        b = jnp.zeros((1, fan_out), jnp.float32)
        params.append((w, b))
    return params


def normalized_adjacency(edge_index, num_nodes):
    """Dense symmetric-normalized adjacency with (remaining) self-loops."""
    src, dst = edge_index
    a = jnp.zeros((num_nodes, num_nodes), jnp.float32)
    a = a.at[dst, src].set(1.0)
    a = jnp.maximum(a, a.T)                                     # undirected
    a = jnp.maximum(a, jnp.eye(num_nodes, dtype=jnp.float32))   # self-loops, weight 1
    deg = a.sum(axis=1)
    d_inv_sqrt = jnp.where(deg > 0, 1.0 / jnp.sqrt(deg), 0.0)
    return a * d_inv_sqrt[:, None] * d_inv_sqrt[None, :]


def basic_gnn_forward(x, edge_index, params):
    """BasicGNN.forward with jk='last', out_channels set, norm=None, dropout=0."""
    n, c_in = x.shape
    c_out = params[-1][0].shape[1]

    # Per-layer lane-dense padding: input channels get their own pad; hidden /
    # output channels share one pad.
    c_in_pad = _round_up(c_in, LANE)
    c_pad = _round_up(max(w.shape[1] for w, _ in params), LANE)
    n_pad = _round_up(max(n, 8), LANE)

    a_hat = normalized_adjacency(edge_index, n)
    a_pad = _pad2d(a_hat, n_pad, n_pad, jnp.bfloat16)     # bf16 MXU operand
    x_pad = _pad2d(x, n_pad, c_in_pad, jnp.bfloat16)

    w0, b0 = params[0]
    w0_pad = _pad2d(w0, c_in_pad, c_pad, jnp.bfloat16)
    b0_pad = _pad2d(b0, 1, c_pad)                         # bias stays f32

    # Layers 1..L-1 stacked behind a dummy entry at index 0 so the W BlockSpec
    # index_map stays trivially `lambda l: (l, 0, 0)` (block l == layer l).
    dummy_w = jnp.zeros((c_pad, c_pad), jnp.bfloat16)
    dummy_b = jnp.zeros((1, c_pad), jnp.float32)
    w_stack = jnp.stack([dummy_w] + [_pad2d(w, c_pad, c_pad, jnp.bfloat16)
                                     for w, _ in params[1:]])
    b_stack = jnp.stack([dummy_b] + [_pad2d(b, 1, c_pad) for _, b in params[1:]])

    try:
        out_pad = fused_gcn_stack(a_pad, x_pad, w0_pad, b0_pad, w_stack, b_stack,
                                  single_buffer=True)
    except Exception:
        # Fallback if pipeline_mode=pl.Buffered(1) is unsupported on this build.
        out_pad = fused_gcn_stack(a_pad, x_pad, w0_pad, b0_pad, w_stack, b_stack,
                                  single_buffer=False)
    return out_pad[:n, :c_out]


def reference_forward(x, edge_index, params):
    """Pure-JAX f32 reference (high-precision matmuls) for correctness checking."""
    hp = jax.lax.Precision.HIGHEST
    a_hat = normalized_adjacency(edge_index, x.shape[0])
    h = x
    for i, (w, b) in enumerate(params):
        h = jnp.dot(a_hat, jnp.dot(h, w, precision=hp), precision=hp) + b
        if i < len(params) - 1:
            h = jnp.maximum(h, 0.0)
    return h


# --------------------------------- main --------------------------------------
if __name__ == "__main__":
    key = jax.random.PRNGKey(0)

    num_nodes = 16
    in_channels = 16
    hidden_channels = 32
    out_channels = 8
    num_layers = 3
    num_edges = 40

    k_x, k_e, k_p = jax.random.split(key, 3)
    x = jax.random.normal(k_x, (num_nodes, in_channels), jnp.float32)
    edge_index = jax.random.randint(k_e, (2, num_edges), 0, num_nodes, jnp.int32)

    params = make_params(k_p, in_channels, hidden_channels, out_channels, num_layers)

    out = basic_gnn_forward(x, edge_index, params)
    jax.block_until_ready(out)

    assert out.shape == (num_nodes, out_channels), out.shape
    assert out.dtype == jnp.float32

    ref = reference_forward(x, edge_index, params)
    max_err = float(jnp.max(jnp.abs(out - ref)))
    # bf16 MXU operands with f32 accumulation -> slightly relaxed tolerance.
    assert jnp.allclose(out, ref, rtol=2e-2, atol=2e-2), max_err

    print("KERNEL_OK")
</pallas_src>

<mosaic_0001>
module attributes {stable_mosaic.version = 11 : i64} {
  func.func @fused_gcn_kernel(%arg0: i32, %arg1: memref<128x128xbf16, #tpu.memory_space<vmem>>, %arg2: memref<128x128xbf16, #tpu.memory_space<vmem>>, %arg3: memref<128x128xbf16, #tpu.memory_space<vmem>>, %arg4: memref<1x128xf32, #tpu.memory_space<vmem>>, %arg5: memref<1x128x128xbf16, #tpu.memory_space<vmem>>, %arg6: memref<1x1x128xf32, #tpu.memory_space<vmem>>, %arg7: memref<128x128xf32, #tpu.memory_space<vmem>>) attributes {dimension_semantics = [#tpu.dimension_semantics<arbitrary>], iteration_bounds = array<i64: 3>, scalar_prefetch = 0 : i64, scratch_operands = 0 : i64, tpu.core_type = #tpu.core_type<tc>, window_params = [{pipeline_mode = #tpu.pipeline_mode<synchronous>, transform_indices = @transform_0, window_bounds = array<i64: 128, 128>}, {pipeline_mode = #tpu.pipeline_mode<synchronous>, transform_indices = @transform_1, window_bounds = array<i64: 128, 128>}, {pipeline_mode = #tpu.pipeline_mode<synchronous>, transform_indices = @transform_2, window_bounds = array<i64: 128, 128>}, {pipeline_mode = #tpu.pipeline_mode<synchronous>, transform_indices = @transform_3, window_bounds = array<i64: 1, 128>}, {transform_indices = @transform_4, window_bounds = array<i64: 1, 128, 128>}, {transform_indices = @transform_5, window_bounds = array<i64: 1, 1, 128>}, {pipeline_mode = #tpu.pipeline_mode<synchronous>, transform_indices = @transform_6, window_bounds = array<i64: 128, 128>}]} {
    %c0_i32 = arith.constant 0 : i32
    %0 = arith.cmpi eq, %arg0, %c0_i32 : i32
    %1 = arith.extui %0 : i1 to i32
    %c0_i32_0 = arith.constant 0 : i32
    %2 = arith.cmpi ne, %1, %c0_i32_0 : i32
    scf.if %2 {
      %c0 = arith.constant 0 : index
      %c0_3 = arith.constant 0 : index
      %6 = vector.load %arg2[%c0, %c0_3] : memref<128x128xbf16, #tpu.memory_space<vmem>>, vector<128x128xbf16>
      %c0_4 = arith.constant 0 : index
      %c0_5 = arith.constant 0 : index
      %7 = vector.load %arg3[%c0_4, %c0_5] : memref<128x128xbf16, #tpu.memory_space<vmem>>, vector<128x128xbf16>
      %c0_6 = arith.constant 0 : index
      %c0_7 = arith.constant 0 : index
      %8 = vector.load %arg4[%c0_6, %c0_7] : memref<1x128xf32, #tpu.memory_space<vmem>>, vector<1x128xf32>
      %cst = arith.constant dense<0.000000e+00> : vector<128x128xf32>
      %9 = tpu.matmul %6, %7, %cst {dimension_numbers = #tpu.dot_dimension_numbers<[1], [0], [0], [1], [0, 0, 1, 1], [], []>} : vector<128x128xbf16>, vector<128x128xbf16>, vector<128x128xf32> -> vector<128x128xf32>
      %c0_8 = arith.constant 0 : index
      %c0_9 = arith.constant 0 : index
      %10 = vector.load %arg1[%c0_8, %c0_9] : memref<128x128xbf16, #tpu.memory_space<vmem>>, vector<128x128xbf16>
      %11 = arith.truncf %9 : vector<128x128xf32> to vector<128x128xbf16>
      %cst_10 = arith.constant dense<0.000000e+00> : vector<128x128xf32>
      %12 = tpu.matmul %10, %11, %cst_10 {dimension_numbers = #tpu.dot_dimension_numbers<[1], [0], [0], [1], [0, 0, 1, 1], [], []>} : vector<128x128xbf16>, vector<128x128xbf16>, vector<128x128xf32> -> vector<128x128xf32>
      %13 = vector.broadcast %8 : vector<1x128xf32> to vector<128x128xf32>
      %14 = arith.addf %12, %13 : vector<128x128xf32>
      %c2_i32 = arith.constant 2 : i32
      %15 = arith.cmpi ne, %arg0, %c2_i32 : i32
      %16 = arith.extui %15 : i1 to i32
      %c0_i32_11 = arith.constant 0 : i32
      %17 = arith.cmpi ne, %16, %c0_i32_11 : i32
      scf.if %17 {
        %cst_14 = arith.constant 0.000000e+00 : f32
        %21 = vector.broadcast %cst_14 : f32 to vector<128x128xf32>
        %22 = arith.maximumf %14, %21 : vector<128x128xf32>
        %c0_15 = arith.constant 0 : index
        %c0_16 = arith.constant 0 : index
        %23 = vector.load %arg7[%c0_15, %c0_16] : memref<128x128xf32, #tpu.memory_space<vmem>>, vector<128x128xf32>
        tpu.vector_store %arg7[%c0_15, %c0_16], %22 {strides = array<i32>} : memref<128x128xf32, #tpu.memory_space<vmem>>, vector<128x128xf32>,
      } else {
      }
      %c2_i32_12 = arith.constant 2 : i32
      %18 = arith.cmpi eq, %arg0, %c2_i32_12 : i32
      %19 = arith.extui %18 : i1 to i32
      %c0_i32_13 = arith.constant 0 : i32
      %20 = arith.cmpi ne, %19, %c0_i32_13 : i32
      scf.if %20 {
        %c0_14 = arith.constant 0 : index
        %c0_15 = arith.constant 0 : index
        %21 = vector.load %arg7[%c0_14, %c0_15] : memref<128x128xf32, #tpu.memory_space<vmem>>, vector<128x128xf32>
        tpu.vector_store %arg7[%c0_14, %c0_15], %14 {strides = array<i32>} : memref<128x128xf32, #tpu.memory_space<vmem>>, vector<128x128xf32>,
      } else {
      }
    } else {
    }
    %c0_i32_1 = arith.constant 0 : i32
    %3 = arith.cmpi ne, %arg0, %c0_i32_1 : i32
    %4 = arith.extui %3 : i1 to i32
    %c0_i32_2 = arith.constant 0 : i32
    %5 = arith.cmpi ne, %4, %c0_i32_2 : i32
    scf.if %5 {
      %c0 = arith.constant 0 : index
      %c0_3 = arith.constant 0 : index
      %6 = vector.load %arg7[%c0, %c0_3] : memref<128x128xf32, #tpu.memory_space<vmem>>, vector<128x128xf32>
      %7 = arith.truncf %6 : vector<128x128xf32> to vector<128x128xbf16>
      %c0_4 = arith.constant 0 : index
      %c0_5 = arith.constant 0 : index
      %c0_6 = arith.constant 0 : index
      %8 = vector.load %arg5[%c0_4, %c0_5, %c0_6] : memref<1x128x128xbf16, #tpu.memory_space<vmem>>, vector<1x128x128xbf16>
      %9 = vector.shape_cast %8 : vector<1x128x128xbf16> to vector<128x128xbf16>
      %c0_7 = arith.constant 0 : index
      %c0_8 = arith.constant 0 : index
      %c0_9 = arith.constant 0 : index
      %10 = vector.load %arg6[%c0_7, %c0_8, %c0_9] : memref<1x1x128xf32, #tpu.memory_space<vmem>>, vector<1x1x128xf32>
      %11 = vector.shape_cast %10 : vector<1x1x128xf32> to vector<1x128xf32>
      %cst = arith.constant dense<0.000000e+00> : vector<128x128xf32>
      %12 = tpu.matmul %7, %9, %cst {dimension_numbers = #tpu.dot_dimension_numbers<[1], [0], [0], [1], [0, 0, 1, 1], [], []>} : vector<128x128xbf16>, vector<128x128xbf16>, vector<128x128xf32> -> vector<128x128xf32>
      %c0_10 = arith.constant 0 : index
      %c0_11 = arith.constant 0 : index
      %13 = vector.load %arg1[%c0_10, %c0_11] : memref<128x128xbf16, #tpu.memory_space<vmem>>, vector<128x128xbf16>
      %14 = arith.truncf %12 : vector<128x128xf32> to vector<128x128xbf16>
      %cst_12 = arith.constant dense<0.000000e+00> : vector<128x128xf32>
      %15 = tpu.matmul %13, %14, %cst_12 {dimension_numbers = #tpu.dot_dimension_numbers<[1], [0], [0], [1], [0, 0, 1, 1], [], []>} : vector<128x128xbf16>, vector<128x128xbf16>, vector<128x128xf32> -> vector<128x128xf32>
      %16 = vector.broadcast %11 : vector<1x128xf32> to vector<128x128xf32>
      %17 = arith.addf %15, %16 : vector<128x128xf32>
      %c2_i32 = arith.constant 2 : i32
      %18 = arith.cmpi ne, %arg0, %c2_i32 : i32
      %19 = arith.extui %18 : i1 to i32
      %c0_i32_13 = arith.constant 0 : i32
      %20 = arith.cmpi ne, %19, %c0_i32_13 : i32
      scf.if %20 {
        %cst_16 = arith.constant 0.000000e+00 : f32
        %24 = vector.broadcast %cst_16 : f32 to vector<128x128xf32>
        %25 = arith.maximumf %17, %24 : vector<128x128xf32>
        %c0_17 = arith.constant 0 : index
        %c0_18 = arith.constant 0 : index
        %26 = vector.load %arg7[%c0_17, %c0_18] : memref<128x128xf32, #tpu.memory_space<vmem>>, vector<128x128xf32>
        tpu.vector_store %arg7[%c0_17, %c0_18], %25 {strides = array<i32>} : memref<128x128xf32, #tpu.memory_space<vmem>>, vector<128x128xf32>,
      } else {
      }
      %c2_i32_14 = arith.constant 2 : i32
      %21 = arith.cmpi eq, %arg0, %c2_i32_14 : i32
      %22 = arith.extui %21 : i1 to i32
      %c0_i32_15 = arith.constant 0 : i32
      %23 = arith.cmpi ne, %22, %c0_i32_15 : i32
      scf.if %23 {
        %c0_16 = arith.constant 0 : index
        %c0_17 = arith.constant 0 : index
        %24 = vector.load %arg7[%c0_16, %c0_17] : memref<128x128xf32, #tpu.memory_space<vmem>>, vector<128x128xf32>
        tpu.vector_store %arg7[%c0_16, %c0_17], %17 {strides = array<i32>} : memref<128x128xf32, #tpu.memory_space<vmem>>, vector<128x128xf32>,
      } else {
      }
    } else {
    }
    return
  }
  func.func @transform_0(%arg0: i32) -> (i32, i32) {
    %c0_i32 = arith.constant 0 : i32
    %c0_i32_0 = arith.constant 0 : i32
    %c0_i32_1 = arith.constant 0 : i32
    return %c0_i32, %c0_i32_0 : i32, i32
  }
  func.func @transform_1(%arg0: i32) -> (i32, i32) {
    %c0_i32 = arith.constant 0 : i32
    %c0_i32_0 = arith.constant 0 : i32
    %c0_i32_1 = arith.constant 0 : i32
    return %c0_i32, %c0_i32_0 : i32, i32
  }
  func.func @transform_2(%arg0: i32) -> (i32, i32) {
    %c0_i32 = arith.constant 0 : i32
    %c0_i32_0 = arith.constant 0 : i32
    %c0_i32_1 = arith.constant 0 : i32
    return %c0_i32, %c0_i32_0 : i32, i32
  }
  func.func @transform_3(%arg0: i32) -> (i32, i32) {
    %c0_i32 = arith.constant 0 : i32
    %c0_i32_0 = arith.constant 0 : i32
    %c0_i32_1 = arith.constant 0 : i32
    return %c0_i32, %c0_i32_0 : i32, i32
  }
  func.func @transform_4(%arg0: i32) -> (i32, i32, i32) {
    %c0_i32 = arith.constant 0 : i32
    %c0_i32_0 = arith.constant 0 : i32
    %c0_i32_1 = arith.constant 0 : i32
    return %arg0, %c0_i32, %c0_i32_0 : i32, i32, i32
  }
  func.func @transform_5(%arg0: i32) -> (i32, i32, i32) {
    %c0_i32 = arith.constant 0 : i32
    %c0_i32_0 = arith.constant 0 : i32
    %c0_i32_1 = arith.constant 0 : i32
    return %arg0, %c0_i32, %c0_i32_0 : i32, i32, i32
  }
  func.func @transform_6(%arg0: i32) -> (i32, i32) {
    %c0_i32 = arith.constant 0 : i32
    %c0_i32_0 = arith.constant 0 : i32
    %c0_i32_1 = arith.constant 0 : i32
    return %c0_i32, %c0_i32_0 : i32, i32
  }
}

module attributes {stable_mosaic.version = 11 : i64} {
  func.func @fused_gcn_kernel(%arg0: i32, %arg1: memref<128x128xbf16, #tpu.memory_space<vmem>>, %arg2: memref<128x128xbf16, #tpu.memory_space<vmem>>, %arg3: memref<128x128xbf16, #tpu.memory_space<vmem>>, %arg4: memref<1x128xf32, #tpu.memory_space<vmem>>, %arg5: memref<1x128x128xbf16, #tpu.memory_space<vmem>>, %arg6: memref<1x1x128xf32, #tpu.memory_space<vmem>>, %arg7: memref<128x128xf32, #tpu.memory_space<vmem>>) attributes {dimension_semantics = [#tpu.dimension_semantics<arbitrary>], iteration_bounds = array<i64: 3>, scalar_prefetch = 0 : i64, scratch_operands = 0 : i64, tpu.core_type = #tpu.core_type<tc>, window_params = [{pipeline_mode = #tpu.pipeline_mode<synchronous>, transform_indices = @transform_0, window_bounds = array<i64: 128, 128>}, {pipeline_mode = #tpu.pipeline_mode<synchronous>, transform_indices = @transform_1, window_bounds = array<i64: 128, 128>}, {pipeline_mode = #tpu.pipeline_mode<synchronous>, transform_indices = @transform_2, window_bounds = array<i64: 128, 128>}, {pipeline_mode = #tpu.pipeline_mode<synchronous>, transform_indices = @transform_3, window_bounds = array<i64: 1, 128>}, {transform_indices = @transform_4, window_bounds = array<i64: 1, 128, 128>}, {transform_indices = @transform_5, window_bounds = array<i64: 1, 1, 128>}, {pipeline_mode = #tpu.pipeline_mode<synchronous>, transform_indices = @transform_6, window_bounds = array<i64: 128, 128>}]} {
    %c0_i32 = arith.constant 0 : i32
    %0 = arith.cmpi eq, %arg0, %c0_i32 : i32
    %1 = arith.extui %0 : i1 to i32
    %c0_i32_0 = arith.constant 0 : i32
    %2 = arith.cmpi ne, %1, %c0_i32_0 : i32
    scf.if %2 {
      %c0 = arith.constant 0 : index
      %c0_3 = arith.constant 0 : index
      %6 = vector.load %arg2[%c0, %c0_3] : memref<128x128xbf16, #tpu.memory_space<vmem>>, vector<128x128xbf16>
      %c0_4 = arith.constant 0 : index
      %c0_5 = arith.constant 0 : index
      %7 = vector.load %arg3[%c0_4, %c0_5] : memref<128x128xbf16, #tpu.memory_space<vmem>>, vector<128x128xbf16>
      %c0_6 = arith.constant 0 : index
      %c0_7 = arith.constant 0 : index
      %8 = vector.load %arg4[%c0_6, %c0_7] : memref<1x128xf32, #tpu.memory_space<vmem>>, vector<1x128xf32>
      %cst = arith.constant dense<0.000000e+00> : vector<128x128xf32>
      %9 = tpu.matmul %6, %7, %cst {dimension_numbers = #tpu.dot_dimension_numbers<[1], [0], [0], [1], [0, 0, 1, 1], [], []>} : vector<128x128xbf16>, vector<128x128xbf16>, vector<128x128xf32> -> vector<128x128xf32>
      %c0_8 = arith.constant 0 : index
      %c0_9 = arith.constant 0 : index
      %10 = vector.load %arg1[%c0_8, %c0_9] : memref<128x128xbf16, #tpu.memory_space<vmem>>, vector<128x128xbf16>
      %11 = arith.truncf %9 : vector<128x128xf32> to vector<128x128xbf16>
      %cst_10 = arith.constant dense<0.000000e+00> : vector<128x128xf32>
      %12 = tpu.matmul %10, %11, %cst_10 {dimension_numbers = #tpu.dot_dimension_numbers<[1], [0], [0], [1], [0, 0, 1, 1], [], []>} : vector<128x128xbf16>, vector<128x128xbf16>, vector<128x128xf32> -> vector<128x128xf32>
      %13 = vector.broadcast %8 : vector<1x128xf32> to vector<128x128xf32>
      %14 = arith.addf %12, %13 : vector<128x128xf32>
      %c2_i32 = arith.constant 2 : i32
      %15 = arith.cmpi ne, %arg0, %c2_i32 : i32
      %16 = arith.extui %15 : i1 to i32
      %c0_i32_11 = arith.constant 0 : i32
      %17 = arith.cmpi ne, %16, %c0_i32_11 : i32
      scf.if %17 {
        %cst_14 = arith.constant 0.000000e+00 : f32
        %21 = vector.broadcast %cst_14 : f32 to vector<128x128xf32>
        %22 = arith.maximumf %14, %21 : vector<128x128xf32>
        %c0_15 = arith.constant 0 : index
        %c0_16 = arith.constant 0 : index
        %23 = vector.load %arg7[%c0_15, %c0_16] : memref<128x128xf32, #tpu.memory_space<vmem>>, vector<128x128xf32>
        tpu.vector_store %arg7[%c0_15, %c0_16], %22 {strides = array<i32>} : memref<128x128xf32, #tpu.memory_space<vmem>>, vector<128x128xf32>,
      } else {
      }
      %c2_i32_12 = arith.constant 2 : i32
      %18 = arith.cmpi eq, %arg0, %c2_i32_12 : i32
      %19 = arith.extui %18 : i1 to i32
      %c0_i32_13 = arith.constant 0 : i32
      %20 = arith.cmpi ne, %19, %c0_i32_13 : i32
      scf.if %20 {
        %c0_14 = arith.constant 0 : index
        %c0_15 = arith.constant 0 : index
        %21 = vector.load %arg7[%c0_14, %c0_15] : memref<128x128xf32, #tpu.memory_space<vmem>>, vector<128x128xf32>
        tpu.vector_store %arg7[%c0_14, %c0_15], %14 {strides = array<i32>} : memref<128x128xf32, #tpu.memory_space<vmem>>, vector<128x128xf32>,
      } else {
      }
    } else {
    }
    %c0_i32_1 = arith.constant 0 : i32
    %3 = arith.cmpi ne, %arg0, %c0_i32_1 : i32
    %4 = arith.extui %3 : i1 to i32
    %c0_i32_2 = arith.constant 0 : i32
    %5 = arith.cmpi ne, %4, %c0_i32_2 : i32
    scf.if %5 {
      %c0 = arith.constant 0 : index
      %c0_3 = arith.constant 0 : index
      %6 = vector.load %arg7[%c0, %c0_3] : memref<128x128xf32, #tpu.memory_space<vmem>>, vector<128x128xf32>
      %7 = arith.truncf %6 : vector<128x128xf32> to vector<128x128xbf16>
      %c0_4 = arith.constant 0 : index
      %c0_5 = arith.constant 0 : index
      %c0_6 = arith.constant 0 : index
      %8 = vector.load %arg5[%c0_4, %c0_5, %c0_6] : memref<1x128x128xbf16, #tpu.memory_space<vmem>>, vector<1x128x128xbf16>
      %9 = vector.shape_cast %8 : vector<1x128x128xbf16> to vector<128x128xbf16>
      %c0_7 = arith.constant 0 : index
      %c0_8 = arith.constant 0 : index
      %c0_9 = arith.constant 0 : index
      %10 = vector.load %arg6[%c0_7, %c0_8, %c0_9] : memref<1x1x128xf32, #tpu.memory_space<vmem>>, vector<1x1x128xf32>
      %11 = vector.shape_cast %10 : vector<1x1x128xf32> to vector<1x128xf32>
      %cst = arith.constant dense<0.000000e+00> : vector<128x128xf32>
      %12 = tpu.matmul %7, %9, %cst {dimension_numbers = #tpu.dot_dimension_numbers<[1], [0], [0], [1], [0, 0, 1, 1], [], []>} : vector<128x128xbf16>, vector<128x128xbf16>, vector<128x128xf32> -> vector<128x128xf32>
      %c0_10 = arith.constant 0 : index
      %c0_11 = arith.constant 0 : index
      %13 = vector.load %arg1[%c0_10, %c0_11] : memref<128x128xbf16, #tpu.memory_space<vmem>>, vector<128x128xbf16>
      %14 = arith.truncf %12 : vector<128x128xf32> to vector<128x128xbf16>
      %cst_12 = arith.constant dense<0.000000e+00> : vector<128x128xf32>
      %15 = tpu.matmul %13, %14, %cst_12 {dimension_numbers = #tpu.dot_dimension_numbers<[1], [0], [0], [1], [0, 0, 1, 1], [], []>} : vector<128x128xbf16>, vector<128x128xbf16>, vector<128x128xf32> -> vector<128x128xf32>
      %16 = vector.broadcast %11 : vector<1x128xf32> to vector<128x128xf32>
      %17 = arith.addf %15, %16 : vector<128x128xf32>
      %c2_i32 = arith.constant 2 : i32
      %18 = arith.cmpi ne, %arg0, %c2_i32 : i32
      %19 = arith.extui %18 : i1 to i32
      %c0_i32_13 = arith.constant 0 : i32
      %20 = arith.cmpi ne, %19, %c0_i32_13 : i32
      scf.if %20 {
        %cst_16 = arith.constant 0.000000e+00 : f32
        %24 = vector.broadcast %cst_16 : f32 to vector<128x128xf32>
        %25 = arith.maximumf %17, %24 : vector<128x128xf32>
        %c0_17 = arith.constant 0 : index
        %c0_18 = arith.constant 0 : index
        %26 = vector.load %arg7[%c0_17, %c0_18] : memref<128x128xf32, #tpu.memory_space<vmem>>, vector<128x128xf32>
        tpu.vector_store %arg7[%c0_17, %c0_18], %25 {strides = array<i32>} : memref<128x128xf32, #tpu.memory_space<vmem>>, vector<128x128xf32>,
      } else {
      }
      %c2_i32_14 = arith.constant 2 : i32
      %21 = arith.cmpi eq, %arg0, %c2_i32_14 : i32
      %22 = arith.extui %21 : i1 to i32
      %c0_i32_15 = arith.constant 0 : i32
      %23 = arith.cmpi ne, %22, %c0_i32_15 : i32
      scf.if %23 {
        %c0_16 = arith.constant 0 : index
        %c0_17 = arith.constant 0 : index
        %24 = vector.load %arg7[%c0_16, %c0_17] : memref<128x128xf32, #tpu.memory_space<vmem>>, vector<128x128xf32>
        tpu.vector_store %arg7[%c0_16, %c0_17], %17 {strides = array<i32>} : memref<128x128xf32, #tpu.memory_space<vmem>>, vector<128x128xf32>,
      } else {
      }
    } else {
    }
    return
  }
  func.func @transform_0(%arg0: i32) -> (i32, i32) {
    %c0_i32 = arith.constant 0 : i32
    %c0_i32_0 = arith.constant 0 : i32
    %c0_i32_1 = arith.constant 0 : i32
    return %c0_i32, %c0_i32_0 : i32, i32
  }
  func.func @transform_1(%arg0: i32) -> (i32, i32) {
    %c0_i32 = arith.constant 0 : i32
    %c0_i32_0 = arith.constant 0 : i32
    %c0_i32_1 = arith.constant 0 : i32
    return %c0_i32, %c0_i32_0 : i32, i32
  }
  func.func @transform_2(%arg0: i32) -> (i32, i32) {
    %c0_i32 = arith.constant 0 : i32
    %c0_i32_0 = arith.constant 0 : i32
    %c0_i32_1 = arith.constant 0 : i32
    return %c0_i32, %c0_i32_0 : i32, i32
  }
  func.func @transform_3(%arg0: i32) -> (i32, i32) {
    %c0_i32 = arith.constant 0 : i32
    %c0_i32_0 = arith.constant 0 : i32
    %c0_i32_1 = arith.constant 0 : i32
    return %c0_i32, %c0_i32_0 : i32, i32
  }
  func.func @transform_4(%arg0: i32) -> (i32, i32, i32) {
    %c0_i32 = arith.constant 0 : i32
    %c0_i32_0 = arith.constant 0 : i32
    %c0_i32_1 = arith.constant 0 : i32
    return %arg0, %c0_i32, %c0_i32_0 : i32, i32, i32
  }
  func.func @transform_5(%arg0: i32) -> (i32, i32, i32) {
    %c0_i32 = arith.constant 0 : i32
    %c0_i32_0 = arith.constant 0 : i32
    %c0_i32_1 = arith.constant 0 : i32
    return %arg0, %c0_i32, %c0_i32_0 : i32, i32, i32
  }
  func.func @transform_6(%arg0: i32) -> (i32, i32) {
    %c0_i32 = arith.constant 0 : i32
    %c0_i32_0 = arith.constant 0 : i32
    %c0_i32_1 = arith.constant 0 : i32
    return %c0_i32, %c0_i32_0 : i32, i32
  }
}

</mosaic_0001>

<bundles_post_ra>
// kernel: tpu_custom_call.1
= control target key start
LH: loop header
LB: loop body
LE: loop exit
PB: predicated region body
PF: predicated region fallthrough
CT: control target
= control target key end

     0   :  { %11 = vsyncpa [#allocation3], 0  ;;  %s1905_s0 = inlined_call_operand.hbm [shape: bf16[128,128], index: 0, kind: input, shape index: {}]   ;;  %s1906_s1 = inlined_call_operand.hbm [shape: bf16[128,128], index: 1, kind: input, shape index: {}]   ;;  %s1907_s2 = inlined_call_operand.hbm [shape: bf16[128,128], index: 2, kind: input, shape index: {}]   ;;  %s1908_s3 = inlined_call_operand.vmem [shape: f32[1,128], index: 3, kind: input, shape index: {}]   ;;  %s1909_s4 = inlined_call_operand.hbm [shape: bf16[3,128,128], index: 4, kind: input, shape index: {}]   ;;  %s1910_s5 = inlined_call_operand.vmem [shape: f32[3,1,128], index: 5, kind: input, shape index: {}]   ;;  %s1911_s6 = inlined_call_operand.hbm [shape: f32[128,128], index: 6, kind: output, shape index: {}]  }
   0x1   :  { %12 = vsyncpa [#allocation6], 0 }
   0x2   :  { %13 = vsyncpa [#allocation9], 0 }
   0x3   :  { %15 = vsyncpa [#allocation9 + $0x1], 0 }
   0x4   :  { %16 = vsyncpa [#allocation4], 0  ;;  %s1688_s21 = smov 0   ;;  %s1690_s22 = smov 0  }
   0x5   :  { %s1692_s23 = smov 0   ;;  %s1694_s24 = smov 0  }
   0x6 LB: > { %s1707_s25 = sadd.s32 4294967295, %s1643_s24   ;;  %p126_p0 = scmp.ne.s32.totalorder %s1635_s22, %s1631_s21  ;;  %s1643_s24 = sphi %s1694_s24, %s1919_s24   ;;  %s1639_s23 = sphi %s1692_s23, %s1918_s23   ;;  %s1635_s22 = sphi %s1690_s22, %s1917_s22   ;;  %s1631_s21 = sphi %s1688_s21, %s1916_s21  }
   0x7   : > { %p127_p1 = scmp.eq.s32.totalorder %s1707_s25, 0  ;;  %p1110_p2 = scmp.ge.s32.totalorder %s1643_s24, 1 }
   0x8   : > { %p184_p3 = scmp.lt.s32.totalorder %s1643_s24, 4  ;;  %p1111_p4 = scmp.ne.s32.totalorder %s1707_s25, 0 }
   0x9   : > { %p1716_p5 = por %p127_p1, %p126_p0  ;;  %s209_s30 = sshll.u32 %s1906_s1, 4  ;;  %s210_s30 = int_to_ptr.hbm [resolvable:$true] %s209_s30 }
   0xa   : > { %p1720_p6 = pnand %p1110_p2, %p184_p3  ;;  %s1645_s7 = smov [#allocation5]  }
   0xb   : > { %s211_s8 = sshll.u32 %s1645_s7, 4  ;;  %s195_s12 = sshll.u32 %s1905_s0, 4  ;;  %s212_s8 = int_to_ptr.vmem [resolvable:$true] %s211_s8  ;;  %s196_s12 = int_to_ptr.hbm [resolvable:$true] %s195_s12 }
   0xc   : > { %p1384_p7 = pneg %p1720_p6  ;;  %s1646_s13 = smov 64  }
   0xd   : > { %s1647_s14 = smov 4   ;;  %s1648_s15 = smov [#allocation2]  }
   0xe   : > { %p1731_p8 = pnand %p1384_p7, %p127_p1  ;;  %s197_s16 = sshll.u32 %s1648_s15, 4  ;;  %s198_s16 = int_to_ptr.vmem [resolvable:$true] %s197_s16 }
   0xf   : > { %s223_s19 = sshll.u32 %s1907_s2, 4  ;;  %s1649_s20 = smov [#allocation7]   ;;  %s224_s19 = int_to_ptr.hbm [resolvable:$true] %s223_s19 }
  0x10   : > { %1390 = dma.hbm_to_vmem [thread:$0]  (!%p1731_p8), %s210_s30, 1024, %s212_s8, [#allocation6], %s1646_s13, %s1646_s13, %s1647_s14  }
  0x11   : > { %1387 = dma.hbm_to_vmem [thread:$0]  (!%p1731_p8), %s196_s12, 1024, %s198_s16, [#allocation3], %s1646_s13, %s1646_s13, %s1647_s14  }
  0x12   : > { %s225_s21 = sshll.u32 %s1649_s20, 4  ;;  %s1752_s28 = sadd.s32 1, %s1643_s24   ;;  %s226_s21 = int_to_ptr.vmem [resolvable:$true] %s225_s21 }
  0x13   : > { %1393 = dma.hbm_to_vmem [thread:$0]  (!%p1731_p8), %s224_s19, 1024, %s226_s21, [#allocation6], %s1646_s13, %s1646_s13, %s1647_s14  }
  0x14   : > { %s110_s29 = ssub.s32 %s1643_s24, %s1752_s28  ;;  %s113_s30 = sadd.s32 1, %s1639_s23 }
  0x15   : > { %p111_p9 = scmp.eq.s32.totalorder %s110_s29, 0  ;;  %p120_p10 = scmp.ne.s32.totalorder %s1639_s23, %s1635_s22 }
  0x16   : > { %p121_p11 = scmp.eq.s32.totalorder %s1643_s24, 0  ;;  %p1401_p12 = scmp.lt.s32.totalorder %s1643_s24, 3 }
  0x17   : > { %s1767_s7 = scalar_select %p111_p9, %s1639_s23, %s113_s30  }
  0x18   : > { %p122_p13 = por %p121_p11, %p120_p10  ;;  %s242_s8 = sand.u32 1, %s1639_s23  }
  0x19   : > { %s1115_s10 = sshll.u32 %s242_s8, 6  ;;  %s1293_s11 = sshll.u32 %s1643_s24, 6 }
  0x1a   : > { %s251_s9 = scalar_lea.hbm %s1909_s4, %s1293_s11  ;;  %s246_s16 = scalar_lea.vmem [#allocation8], %s1115_s10 }
  0x1b   : > { %s254_s17 = sshll.u32 %s246_s16, 4  ;;  %s252_s18 = sshll.u32 %s251_s9, 4  ;;  %s255_s17 = int_to_ptr.vmem [resolvable:$true] %s254_s17  ;;  %s253_s18 = int_to_ptr.hbm [resolvable:$true] %s252_s18 }
  0x1c   : > { %p1774_p0 = pnand %p1401_p12, %p122_p13  ;;  %s243_s20 = scalar_lea.sflag [#allocation9], %s242_s8 }
  0x1d   : > { %s1539_s21 = sshra.s32 %s253_s18, 4  ;;  %s1546_s10 = scalar_lea.hbm %s1909_s4, 192  ;;  %s1540_s21 = int_to_ptr.hbm [resolvable:$true] %s1539_s21 }
  0x1e   : > { %s1541_s29 = scalar_lea.hbm %s1540_s21, 64  ;;  %p1543_p3 = pneg %p1774_p0 }
  0x1f   : > { %p1542_p2 = scmp.ne.s32.totalorder %s1540_s21, %s1541_s29  ;;  %p1547_p9 = scmp.lt.s32.totalorder %s1540_s21, %s1909_s4 }
  0x20   : > { %p1548_p10 = scmp.lt.s32.totalorder %s1546_s10, %s1541_s29 }
  0x21   : > { %p1544_p7 = pnand %p1543_p3, %p1542_p2 }
  0x22   : > { %p1549_p11 = por %p1548_p10, %p1547_p9 }
  0x23   : > { %p1545_p8 = pneg %p1544_p7 }
  0x25   : > { %p1550_p12 = pnand %p1549_p11, %p1545_p8 }
  0x27   : > { %1553 = shalt.err (!%p1550_p12)
}
  0x28   : > { %1397 = dma.hbm_to_vmem [thread:$0]  (!%p1774_p0), %s253_s18, 1024, %s255_s17, %s243_s20, %s1646_s13, %s1646_s13, %s1647_s14  }
  0x29   : > { %272 = sbr.rel (%p1720_p6) target bundleno = 1035 (0x40b), region = 44 }
  0x2e   : > { %1614 = dma.done.wait (%p127_p1), [#allocation3], 1024  }
  0x2f   : > { %1616 = vsyncadd (%p127_p1), [#allocation3], 4294966272 }
  0x30   : > { %1618 = dma.done.wait (%p127_p1), [#allocation6], 2048  }
  0x31   : > { %1620 = vsyncadd (%p127_p1), [#allocation6], 4294965248  ;;  %s289_s8 = sand.u32 1, %s1635_s22  }
  0x32   : > { %s1122_s15 = sshll.u32 %s289_s8, 6  ;;  %s290_s13 = scalar_lea.sflag [#allocation9], %s289_s8 }
  0x33   : > { %s1802_s14 = scalar_lea.vmem [#allocation8], %s1122_s15 }
  0x34   : > { %1622 = dma.done.wait (%p1716_p5), %s290_s13, 1024  }
  0x35   : > { %1624 = vsyncadd (%p1716_p5), %s290_s13, 4294966272  ;;  %p321_p6 = scmp.lt.s32.totalorder %s1707_s25, 2  ;;  %327 = sbr.rel (%p1111_p4) target bundleno = 541 (0x21d), region = 64 }
  0x36   : > { %p1220_p4 = scmp.eq.s32.totalorder (!%p1111_p4), %s1707_s25, 2 }
  0x37   : > { %s1810_s27 = scalar_select %p321_p6, %s1707_s25, 2 }
  0x39   : > { %s323_s17 = scalar_lea.vmem %s1910_s5, %s1810_s27 }
  0x3a   : > { %v1309_v0 = vld [vmem:[#allocation7 + $0x38] sm:$0xff]  ;;  %v1308_v1 = vld [vmem:[#allocation7 + $0x30] sm:$0xff]  ;;  %v1307_v2 = vld [vmem:[#allocation7 + $0x28] sm:$0xff] }
  0x3b   : > { %1334 = vmatpush.bf16.msra.mxu2 %v1309_v0  ;;  %457 = vmatpush.bf16.msra.mxu0 %v1309_v0  ;;  %v1306_v3 = vld [vmem:[#allocation7 + $0x20] sm:$0xff]  ;;  %v1305_v4 = vld [vmem:[#allocation7 + $0x18] sm:$0xff]  ;;  %v1304_v5 = vld [vmem:[#allocation7 + $0x10] sm:$0xff] }
  0x3c   : > { %v1303_v6 = vld [vmem:[#allocation7 + $0x8] sm:$0xff]  ;;  %v1302_v7 = vld [vmem:[#allocation7] sm:$0xff]  ;;  %v1300_v12 = vld [vmem:[#allocation5 + $0x30] sm:$0xff] }
  0x3d   : > { %v1298_v8 = vld [vmem:[#allocation5 + $0x20] sm:$0xff]  ;;  %v1299_v10 = vld [vmem:[#allocation5 + $0x28] sm:$0xff]  ;;  %v1296_v13 = vld [vmem:[#allocation5 + $0x10] sm:$0xff] }
  0x3e   : > { %v1294_v9 = vld [vmem:[#allocation5] sm:$0xff]  ;;  %v1295_v11 = vld [vmem:[#allocation5 + $0x8] sm:$0xff]  ;;  %v1301_v14 = vld [vmem:[#allocation5 + $0x38] sm:$0xff] }
  0x3f   : > { %1335 = vmatpush.bf16.msra.mxu2 %v1308_v1  ;;  %458 = vmatpush.bf16.msra.mxu0 %v1308_v1  ;;  %v1297_v15 = vld [vmem:[#allocation5 + $0x18] sm:$0xff]  ;;  %v1310_v40 = vld [vmem:[#allocation2] sm:$0xff]  ;;  %v1311_v42 = vld [vmem:[#allocation2 + $0x8] sm:$0xff] }
  0x40   : > { %v1314_v41 = vld [vmem:[#allocation2 + $0x20] sm:$0xff]  ;;  %v1315_v43 = vld [vmem:[#allocation2 + $0x28] sm:$0xff]  ;;  %v1312_v44 = vld [vmem:[#allocation2 + $0x10] sm:$0xff] }
  0x41   : > { %v1316_v45 = vld [vmem:[#allocation2 + $0x30] sm:$0xff]  ;;  %v1313_v46 = vld [vmem:[#allocation2 + $0x18] sm:$0xff]  ;;  %v1447_v48 = vld [vmem:[%s1908_s3] ss:$0 sm:$0xff] }
  0x42   : > { %v1317_v47 = vld [vmem:[#allocation2 + $0x38] sm:$0xff] }
  0x43   : > { %1336 = vmatpush.bf16.msra.mxu2 %v1307_v2  ;;  %459 = vmatpush.bf16.msra.mxu0 %v1307_v2 }
  0x47   : > { %1337 = vmatpush.bf16.msra.mxu2 %v1306_v3  ;;  %460 = vmatpush.bf16.msra.mxu0 %v1306_v3 }
  0x4b   : > { %1338 = vmatpush.bf16.msra.mxu2 %v1305_v4  ;;  %461 = vmatpush.bf16.msra.mxu0 %v1305_v4 }
  0x4f   : > { %1339 = vmatpush.bf16.msra.mxu2 %v1304_v5  ;;  %462 = vmatpush.bf16.msra.mxu0 %v1304_v5 }
  0x53   : > { %1340 = vmatpush.bf16.msra.mxu2 %v1303_v6  ;;  %463 = vmatpush.bf16.msra.mxu0 %v1303_v6 }
  0x57   : > { %1341 = vmatpush.bf16.msra.mxu2 %v1302_v7  ;;  %464 = vmatpush.bf16.msra.mxu0 %v1302_v7 }
  0x5a   : > { %485 = vmatmul.bf16.vlgmr.msra.gmra.mxu2 %v1298_v8  ;;  %465 = vmatmul.bf16.vlgmr.msra.gmra.mxu0 %v1294_v9 }
  0x6a   : > { %490 = vmatmul.bf16.gmra.mxu2 %v1299_v10  ;;  %470 = vmatmul.bf16.gmra.mxu0 %v1295_v11 }
  0x7a   : > { %495 = vmatmul.bf16.gmra.mxu2 %v1300_v12  ;;  %475 = vmatmul.bf16.gmra.mxu0 %v1296_v13 }
  0x8a   : > { %500 = vmatmul.bf16.gmra.mxu2 %v1301_v14  ;;  %480 = vmatmul.bf16.gmra.mxu0 %v1297_v15 }
  0xd7   : > { %v466_v17 = vpop.f32.mrf.mxu0 }
  0xdd   : > { %v486_v16 = vpop.f32.mrf.mxu2 }
  0xdf   : > { %v468_v19 = vpop.f32.mrf.mxu0 }
  0xe0   : > { %v522_v39 = vpack.c.bf16 %v468_v19, %v466_v17 }
  0xe5   : > { %v488_v18 = vpop.f32.mrf.mxu2 }
  0xe6   : > { %v526_v34 = vpack.c.bf16 %v488_v18, %v486_v16 }
  0xe7   : > { %v471_v21 = vpop.f32.mrf.mxu0 }
  0xed   : > { %v491_v20 = vpop.f32.mrf.mxu2 }
  0xef   : > { %v473_v23 = vpop.f32.mrf.mxu0 }
  0xf0   : > { %v523_v38 = vpack.c.bf16 %v473_v23, %v471_v21 }
  0xf5   : > { %v493_v22 = vpop.f32.mrf.mxu2 }
  0xf6   : > { %v527_v33 = vpack.c.bf16 %v493_v22, %v491_v20 }
  0xf7   : > { %v476_v25 = vpop.f32.mrf.mxu0 }
  0xfd   : > { %v496_v24 = vpop.f32.mrf.mxu2 }
  0xff   : > { %v478_v28 = vpop.f32.mrf.mxu0 }
 0x100   : > { %v524_v37 = vpack.c.bf16 %v478_v28, %v476_v25 }
 0x105   : > { %v498_v26 = vpop.f32.mrf.mxu2 }
 0x106   : > { %v528_v32 = vpack.c.bf16 %v498_v26, %v496_v24 }
 0x107   : > { %v481_v31 = vpop.f32.mrf.mxu0 }
 0x10d   : > { %v501_v27 = vpop.f32.mrf.mxu2 }
 0x10f   : > { %v483_v35 = vpop.f32.mrf.mxu0 }
 0x110   : > { %v525_v36 = vpack.c.bf16 %v483_v35, %v481_v31 }
 0x115   : > { %v503_v29 = vpop.f32.mrf.mxu2 }
 0x116   : > { %v529_v30 = vpack.c.bf16 %v503_v29, %v501_v27 }
 0x118   : > { %581 = vmatpush.bf16.msra.mxu1 %v529_v30  ;;  %1342 = vmatpush.bf16.msra.mxu3 %v529_v30 }
 0x11c   : > { %582 = vmatpush.bf16.msra.mxu1 %v528_v32  ;;  %1343 = vmatpush.bf16.msra.mxu3 %v528_v32 }
 0x120   : > { %583 = vmatpush.bf16.msra.mxu1 %v527_v33  ;;  %1344 = vmatpush.bf16.msra.mxu3 %v527_v33 }
 0x124   : > { %584 = vmatpush.bf16.msra.mxu1 %v526_v34  ;;  %1345 = vmatpush.bf16.msra.mxu3 %v526_v34 }
 0x128   : > { %585 = vmatpush.bf16.msra.mxu1 %v525_v36  ;;  %1346 = vmatpush.bf16.msra.mxu3 %v525_v36 }
 0x12c   : > { %586 = vmatpush.bf16.msra.mxu1 %v524_v37  ;;  %1347 = vmatpush.bf16.msra.mxu3 %v524_v37 }
 0x130   : > { %587 = vmatpush.bf16.msra.mxu1 %v523_v38  ;;  %1348 = vmatpush.bf16.msra.mxu3 %v523_v38 }
 0x134   : > { %588 = vmatpush.bf16.msra.mxu1 %v522_v39  ;;  %1349 = vmatpush.bf16.msra.mxu3 %v522_v39 }
 0x137   : > { %589 = vmatmul.bf16.vlgmr.msra.gmra.mxu1 %v1310_v40  ;;  %609 = vmatmul.bf16.vlgmr.msra.gmra.mxu3 %v1314_v41 }
 0x147   : > { %594 = vmatmul.bf16.gmra.mxu1 %v1311_v42  ;;  %614 = vmatmul.bf16.gmra.mxu3 %v1315_v43 }
 0x157   : > { %599 = vmatmul.bf16.gmra.mxu1 %v1312_v44  ;;  %619 = vmatmul.bf16.gmra.mxu3 %v1316_v45 }
 0x167   : > { %604 = vmatmul.bf16.gmra.mxu1 %v1313_v46  ;;  %624 = vmatmul.bf16.gmra.mxu3 %v1317_v47 }
 0x1b4   : > { %v590_v49 = vpop.f32.mrf.mxu1 }
 0x1b5   : > { %v1821_v50 = vadd.f32 %v1447_v48, %v590_v49 }
 0x1ba   : > { %v610_v51 = vpop.f32.mrf.mxu3 }
 0x1bb   : > { %v1823_v52 = vadd.f32 %v1447_v48, %v610_v51 }
 0x1bc   : > { %v592_v53 = vpop.f32.mrf.mxu1 }
 0x1bd   : > { %v1825_v54 = vadd.f32 %v1447_v48, %v592_v53 }
 0x1c2   : > { %v612_v55 = vpop.f32.mrf.mxu3 }
 0x1c3   : > { %v1827_v56 = vadd.f32 %v1447_v48, %v612_v55 }
 0x1c4   : > { %v595_v57 = vpop.f32.mrf.mxu1 }
 0x1c5   : > { %v596_v58 = vadd.f32 %v1447_v48, %v595_v57 }
 0x1ca   : > { %v615_v59 = vpop.f32.mrf.mxu3 }
 0x1cb   : > { %v1829_v60 = vadd.f32 %v1447_v48, %v615_v59 }
 0x1cc   : > { %v597_v61 = vpop.f32.mrf.mxu1 }
 0x1cd   : > { %v598_v62 = vadd.f32 %v1447_v48, %v597_v61 }
 0x1d2   : > { %v617_v63 = vpop.f32.mrf.mxu3 }
 0x1d3   : > { %v1831_v0 = vadd.f32 %v1447_v48, %v617_v63 }
 0x1d4   : > { %v600_v1 = vpop.f32.mrf.mxu1 }
 0x1d5   : > { %v601_v2 = vadd.f32 %v1447_v48, %v600_v1 }
 0x1da   : > { %v620_v3 = vpop.f32.mrf.mxu3 }
 0x1db   : > { %v621_v4 = vadd.f32 %v1447_v48, %v620_v3 }
 0x1dc   : > { %v602_v5 = vpop.f32.mrf.mxu1 }
 0x1dd   : > { %v603_v6 = vadd.f32 %v1447_v48, %v602_v5 }
 0x1e2   : > { %v622_v7 = vpop.f32.mrf.mxu3 }
 0x1e3   : > { %v623_v8 = vadd.f32 %v1447_v48, %v622_v7 }
 0x1e4   : > { %v605_v9 = vpop.f32.mrf.mxu1 }
 0x1e5   : > { %v606_v10 = vadd.f32 %v1447_v48, %v605_v9 }
 0x1ea   : > { %v625_v11 = vpop.f32.mrf.mxu3 }
 0x1eb   : > { %v626_v12 = vadd.f32 %v1447_v48, %v625_v11 }
 0x1ec   : > { %v607_v13 = vpop.f32.mrf.mxu1 }
 0x1ed   : > { %v608_v14 = vadd.f32 %v1447_v48, %v607_v13 }
 0x1ef   : > { %633 = sbr.rel (%p1220_p4) target bundleno = 518 (0x206), region = 68 }
 0x1f2   : > { %v627_v15 = vpop.f32.mrf.mxu3 }
 0x1f3   : > { %v628_v16 = vadd.f32 %v1447_v48, %v627_v15 }
 0x1f4   : > { %v634_v17 = vmax.f32 %v1821_v50, 0.0  ;;  %v635_v18 = vmax.f32 %v1825_v54, 0.0  ;;  %v636_v19 = vmax.f32 %v596_v58, 0.0  ;;  %v637_v20 = vmax.f32 %v598_v62, 0.0 }
 0x1f5   : > { %v638_v21 = vmax.f32 %v601_v2, 0.0  ;;  %v639_v22 = vmax.f32 %v603_v6, 0.0  ;;  %v640_v23 = vmax.f32 %v606_v10, 0.0  ;;  %v641_v24 = vmax.f32 %v608_v14, 0.0 }
 0x1f6   : > { %650 = vst [vmem:[#allocation10] sm:$0xff] %v634_v17  ;;  %v642_v25 = vmax.f32 %v1823_v52, 0.0  ;;  %v643_v26 = vmax.f32 %v1827_v56, 0.0  ;;  %v644_v27 = vmax.f32 %v1829_v60, 0.0  ;;  %v645_v28 = vmax.f32 %v1831_v0, 0.0 }
 0x1f7   : > { %651 = vst [vmem:[#allocation10 + $0x8] sm:$0xff] %v635_v18  ;;  %v646_v29 = vmax.f32 %v621_v4, 0.0  ;;  %v647_v30 = vmax.f32 %v623_v8, 0.0  ;;  %v648_v31 = vmax.f32 %v626_v12, 0.0  ;;  %v649_v32 = vmax.f32 %v628_v16, 0.0 }
 0x1f8   : > { %652 = vst [vmem:[#allocation10 + $0x10] sm:$0xff] %v636_v19 }
 0x1f9   : > { %653 = vst [vmem:[#allocation10 + $0x18] sm:$0xff] %v637_v20 }
 0x1fa   : > { %654 = vst [vmem:[#allocation10 + $0x20] sm:$0xff] %v638_v21 }
 0x1fb   : > { %655 = vst [vmem:[#allocation10 + $0x28] sm:$0xff] %v639_v22 }
 0x1fc   : > { %656 = vst [vmem:[#allocation10 + $0x30] sm:$0xff] %v640_v23 }
 0x1fd   : > { %657 = vst [vmem:[#allocation10 + $0x38] sm:$0xff] %v641_v24 }
 0x1fe   : > { %658 = vst [vmem:[#allocation10 + $0x40] sm:$0xff] %v642_v25 }
 0x1ff   : > { %659 = vst [vmem:[#allocation10 + $0x48] sm:$0xff] %v643_v26 }
 0x200   : > { %660 = vst [vmem:[#allocation10 + $0x50] sm:$0xff] %v644_v27 }
 0x201   : > { %661 = vst [vmem:[#allocation10 + $0x58] sm:$0xff] %v645_v28 }
 0x202   : > { %662 = vst [vmem:[#allocation10 + $0x60] sm:$0xff] %v646_v29 }
 0x203   : > { %663 = vst [vmem:[#allocation10 + $0x68] sm:$0xff] %v647_v30 }
 0x204   : > { %664 = vst [vmem:[#allocation10 + $0x70] sm:$0xff] %v648_v31 }
 0x205   : > { %665 = vst [vmem:[#allocation10 + $0x78] sm:$0xff] %v649_v32 }
 0x206 PF: > { %p1221_p5 = scmp.ne.s32.totalorder %s1707_s25, 2 }
 0x208   : > { %669 = sbr.rel (%p1221_p5) target bundleno = 541 (0x21d), region = 72 }
 0x20d   : > { %670 = vst [vmem:[#allocation10] sm:$0xff] %v1821_v50 }
 0x20e   : > { %671 = vst [vmem:[#allocation10 + $0x8] sm:$0xff] %v1825_v54 }
 0x20f   : > { %672 = vst [vmem:[#allocation10 + $0x10] sm:$0xff] %v596_v58 }
 0x210   : > { %673 = vst [vmem:[#allocation10 + $0x18] sm:$0xff] %v598_v62 }
 0x211   : > { %674 = vst [vmem:[#allocation10 + $0x20] sm:$0xff] %v601_v2 }
 0x212   : > { %675 = vst [vmem:[#allocation10 + $0x28] sm:$0xff] %v603_v6 }
 0x213   : > { %676 = vst [vmem:[#allocation10 + $0x30] sm:$0xff] %v606_v10 }
 0x214   : > { %677 = vst [vmem:[#allocation10 + $0x38] sm:$0xff] %v608_v14 }
 0x215   : > { %678 = vst [vmem:[#allocation10 + $0x40] sm:$0xff] %v1823_v52 }
 0x216   : > { %679 = vst [vmem:[#allocation10 + $0x48] sm:$0xff] %v1827_v56 }
 0x217   : > { %680 = vst [vmem:[#allocation10 + $0x50] sm:$0xff] %v1829_v60 }
 0x218   : > { %681 = vst [vmem:[#allocation10 + $0x58] sm:$0xff] %v1831_v0 }
 0x219   : > { %682 = vst [vmem:[#allocation10 + $0x60] sm:$0xff] %v621_v4 }
 0x21a   : > { %683 = vst [vmem:[#allocation10 + $0x68] sm:$0xff] %v623_v8 }
 0x21b   : > { %684 = vst [vmem:[#allocation10 + $0x70] sm:$0xff] %v626_v12 }
 0x21c   : > { %685 = vst [vmem:[#allocation10 + $0x78] sm:$0xff] %v628_v16 }
 0x21d PF: > { %689 = sbr.rel (%p127_p1) target bundleno = 1029 (0x405), region = 76  ;;  %p1287_p1 = scmp.eq.s32.totalorder (!%p127_p1), %s1707_s25, 2 }
 0x222   : > { %v1325_v33 = vld [vmem:[%s1802_s14 + $0x38] sm:$0xff]  ;;  %v1324_v34 = vld [vmem:[%s1802_s14 + $0x30] sm:$0xff]  ;;  %v1323_v35 = vld [vmem:[%s1802_s14 + $0x28] sm:$0xff] }
 0x223   : > { %1350 = vmatpush.bf16.msra.mxu2 %v1325_v33  ;;  %779 = vmatpush.bf16.msra.mxu0 %v1325_v33  ;;  %v1322_v36 = vld [vmem:[%s1802_s14 + $0x20] sm:$0xff]  ;;  %v1321_v37 = vld [vmem:[%s1802_s14 + $0x18] sm:$0xff]  ;;  %v1320_v38 = vld [vmem:[%s1802_s14 + $0x10] sm:$0xff] }
 0x224   : > { %v1319_v39 = vld [vmem:[%s1802_s14 + $0x8] sm:$0xff]  ;;  %v1318_v40 = vld [vmem:[%s1802_s14] sm:$0xff]  ;;  %v700_v47 = vld [vmem:[#allocation10 + $0x50] sm:$0xff] }
 0x225   : > { %v698_v41 = vld [vmem:[#allocation10 + $0x40] sm:$0xff]  ;;  %v699_v42 = vld [vmem:[#allocation10 + $0x48] sm:$0xff]  ;;  %v701_v48 = vld [vmem:[#allocation10 + $0x58] sm:$0xff] }
 0x226   : > { %v690_v43 = vld [vmem:[#allocation10] sm:$0xff]  ;;  %v691_v44 = vld [vmem:[#allocation10 + $0x8] sm:$0xff]  ;;  %v710_v45 = vpack.c.bf16 %v699_v42, %v698_v41  ;;  %v692_v49 = vld [vmem:[#allocation10 + $0x10] sm:$0xff]  ;;  %v711_v51 = vpack.c.bf16 %v701_v48, %v700_v47 }
 0x227   : > { %1351 = vmatpush.bf16.msra.mxu2 %v1324_v34  ;;  %780 = vmatpush.bf16.msra.mxu0 %v1324_v34  ;;  %v706_v46 = vpack.c.bf16 %v691_v44, %v690_v43  ;;  %v693_v50 = vld [vmem:[#allocation10 + $0x18] sm:$0xff]  ;;  %v702_v53 = vld [vmem:[#allocation10 + $0x60] sm:$0xff]  ;;  %v703_v54 = vld [vmem:[#allocation10 + $0x68] sm:$0xff] }
 0x228   : > { %v707_v52 = vpack.c.bf16 %v693_v50, %v692_v49  ;;  %v694_v55 = vld [vmem:[#allocation10 + $0x20] sm:$0xff]  ;;  %v695_v56 = vld [vmem:[#allocation10 + $0x28] sm:$0xff]  ;;  %v712_v57 = vpack.c.bf16 %v703_v54, %v702_v53  ;;  %v704_v59 = vld [vmem:[#allocation10 + $0x70] sm:$0xff] }
 0x229   : > { %v708_v58 = vpack.c.bf16 %v695_v56, %v694_v55  ;;  %v705_v60 = vld [vmem:[#allocation10 + $0x78] sm:$0xff]  ;;  %v696_v61 = vld [vmem:[#allocation10 + $0x30] sm:$0xff]  ;;  %v1326_v25 = vld [vmem:[#allocation2] sm:$0xff] }
 0x22a   : > { %v697_v62 = vld [vmem:[#allocation10 + $0x38] sm:$0xff]  ;;  %v713_v63 = vpack.c.bf16 %v705_v60, %v704_v59  ;;  %v1330_v26 = vld [vmem:[#allocation2 + $0x20] sm:$0xff]  ;;  %v1327_v27 = vld [vmem:[#allocation2 + $0x8] sm:$0xff] }
 0x22b   : > { %1352 = vmatpush.bf16.msra.mxu2 %v1323_v35  ;;  %781 = vmatpush.bf16.msra.mxu0 %v1323_v35  ;;  %v709_v0 = vpack.c.bf16 %v697_v62, %v696_v61  ;;  %v1331_v28 = vld [vmem:[#allocation2 + $0x28] sm:$0xff]  ;;  %v1328_v29 = vld [vmem:[#allocation2 + $0x10] sm:$0xff]  ;;  %v1329_v31 = vld [vmem:[#allocation2 + $0x18] sm:$0xff] }
 0x22c   : > { %v1332_v30 = vld [vmem:[#allocation2 + $0x30] sm:$0xff]  ;;  %v1333_v32 = vld [vmem:[#allocation2 + $0x38] sm:$0xff]  ;;  %v1448_v33 = vld [vmem:[%s323_s17] ss:$0 sm:$0xff] }
 0x22f   : > { %1353 = vmatpush.bf16.msra.mxu2 %v1322_v36  ;;  %782 = vmatpush.bf16.msra.mxu0 %v1322_v36 }
 0x233   : > { %1354 = vmatpush.bf16.msra.mxu2 %v1321_v37  ;;  %783 = vmatpush.bf16.msra.mxu0 %v1321_v37 }
 0x237   : > { %1355 = vmatpush.bf16.msra.mxu2 %v1320_v38  ;;  %784 = vmatpush.bf16.msra.mxu0 %v1320_v38 }
 0x23b   : > { %1356 = vmatpush.bf16.msra.mxu2 %v1319_v39  ;;  %785 = vmatpush.bf16.msra.mxu0 %v1319_v39 }
 0x23f   : > { %1357 = vmatpush.bf16.msra.mxu2 %v1318_v40  ;;  %786 = vmatpush.bf16.msra.mxu0 %v1318_v40 }
 0x242   : > { %807 = vmatmul.bf16.vlgmr.msra.gmra.mxu2 %v710_v45  ;;  %787 = vmatmul.bf16.vlgmr.msra.gmra.mxu0 %v706_v46 }
 0x252   : > { %812 = vmatmul.bf16.gmra.mxu2 %v711_v51  ;;  %792 = vmatmul.bf16.gmra.mxu0 %v707_v52 }
 0x262   : > { %817 = vmatmul.bf16.gmra.mxu2 %v712_v57  ;;  %797 = vmatmul.bf16.gmra.mxu0 %v708_v58 }
 0x272   : > { %822 = vmatmul.bf16.gmra.mxu2 %v713_v63  ;;  %802 = vmatmul.bf16.gmra.mxu0 %v709_v0 }
 0x2bf   : > { %v788_v2 = vpop.f32.mrf.mxu0 }
 0x2c5   : > { %v808_v1 = vpop.f32.mrf.mxu2 }
 0x2c7   : > { %v790_v4 = vpop.f32.mrf.mxu0 }
 0x2c8   : > { %v844_v24 = vpack.c.bf16 %v790_v4, %v788_v2 }
 0x2cd   : > { %v810_v3 = vpop.f32.mrf.mxu2 }
 0x2ce   : > { %v848_v19 = vpack.c.bf16 %v810_v3, %v808_v1 }
 0x2cf   : > { %v793_v6 = vpop.f32.mrf.mxu0 }
 0x2d5   : > { %v813_v5 = vpop.f32.mrf.mxu2 }
 0x2d7   : > { %v795_v8 = vpop.f32.mrf.mxu0 }
 0x2d8   : > { %v845_v23 = vpack.c.bf16 %v795_v8, %v793_v6 }
 0x2dd   : > { %v815_v7 = vpop.f32.mrf.mxu2 }
 0x2de   : > { %v849_v18 = vpack.c.bf16 %v815_v7, %v813_v5 }
 0x2df   : > { %v798_v10 = vpop.f32.mrf.mxu0 }
 0x2e5   : > { %v818_v9 = vpop.f32.mrf.mxu2 }
 0x2e7   : > { %v800_v13 = vpop.f32.mrf.mxu0 }
 0x2e8   : > { %v846_v22 = vpack.c.bf16 %v800_v13, %v798_v10 }
 0x2ed   : > { %v820_v11 = vpop.f32.mrf.mxu2 }
 0x2ee   : > { %v850_v17 = vpack.c.bf16 %v820_v11, %v818_v9 }
 0x2ef   : > { %v803_v16 = vpop.f32.mrf.mxu0 }
 0x2f5   : > { %v823_v12 = vpop.f32.mrf.mxu2 }
 0x2f7   : > { %v805_v20 = vpop.f32.mrf.mxu0 }
 0x2f8   : > { %v847_v21 = vpack.c.bf16 %v805_v20, %v803_v16 }
 0x2fd   : > { %v825_v14 = vpop.f32.mrf.mxu2 }
 0x2fe   : > { %v851_v15 = vpack.c.bf16 %v825_v14, %v823_v12 }
 0x300   : > { %903 = vmatpush.bf16.msra.mxu1 %v851_v15  ;;  %1358 = vmatpush.bf16.msra.mxu3 %v851_v15 }
 0x304   : > { %904 = vmatpush.bf16.msra.mxu1 %v850_v17  ;;  %1359 = vmatpush.bf16.msra.mxu3 %v850_v17 }
 0x308   : > { %905 = vmatpush.bf16.msra.mxu1 %v849_v18  ;;  %1360 = vmatpush.bf16.msra.mxu3 %v849_v18 }
 0x30c   : > { %906 = vmatpush.bf16.msra.mxu1 %v848_v19  ;;  %1361 = vmatpush.bf16.msra.mxu3 %v848_v19 }
 0x310   : > { %907 = vmatpush.bf16.msra.mxu1 %v847_v21  ;;  %1362 = vmatpush.bf16.msra.mxu3 %v847_v21 }
 0x314   : > { %908 = vmatpush.bf16.msra.mxu1 %v846_v22  ;;  %1363 = vmatpush.bf16.msra.mxu3 %v846_v22 }
 0x318   : > { %909 = vmatpush.bf16.msra.mxu1 %v845_v23  ;;  %1364 = vmatpush.bf16.msra.mxu3 %v845_v23 }
 0x31c   : > { %910 = vmatpush.bf16.msra.mxu1 %v844_v24  ;;  %1365 = vmatpush.bf16.msra.mxu3 %v844_v24 }
 0x31f   : > { %911 = vmatmul.bf16.vlgmr.msra.gmra.mxu1 %v1326_v25  ;;  %931 = vmatmul.bf16.vlgmr.msra.gmra.mxu3 %v1330_v26 }
 0x32f   : > { %916 = vmatmul.bf16.gmra.mxu1 %v1327_v27  ;;  %936 = vmatmul.bf16.gmra.mxu3 %v1331_v28 }
 0x33f   : > { %921 = vmatmul.bf16.gmra.mxu1 %v1328_v29  ;;  %941 = vmatmul.bf16.gmra.mxu3 %v1332_v30 }
 0x34f   : > { %926 = vmatmul.bf16.gmra.mxu1 %v1329_v31  ;;  %946 = vmatmul.bf16.gmra.mxu3 %v1333_v32 }
 0x39c   : > { %v912_v34 = vpop.f32.mrf.mxu1 }
 0x39d   : > { %v1862_v35 = vadd.f32 %v1448_v33, %v912_v34 }
 0x3a2   : > { %v932_v36 = vpop.f32.mrf.mxu3 }
 0x3a3   : > { %v1864_v37 = vadd.f32 %v1448_v33, %v932_v36 }
 0x3a4   : > { %v914_v38 = vpop.f32.mrf.mxu1 }
 0x3a5   : > { %v1866_v39 = vadd.f32 %v1448_v33, %v914_v38 }
 0x3aa   : > { %v934_v40 = vpop.f32.mrf.mxu3 }
 0x3ab   : > { %v1868_v41 = vadd.f32 %v1448_v33, %v934_v40 }
 0x3ac   : > { %v917_v42 = vpop.f32.mrf.mxu1 }
 0x3ad   : > { %v918_v43 = vadd.f32 %v1448_v33, %v917_v42 }
 0x3b2   : > { %v937_v44 = vpop.f32.mrf.mxu3 }
 0x3b3   : > { %v1870_v45 = vadd.f32 %v1448_v33, %v937_v44 }
 0x3b4   : > { %v919_v46 = vpop.f32.mrf.mxu1 }
 0x3b5   : > { %v920_v47 = vadd.f32 %v1448_v33, %v919_v46 }
 0x3ba   : > { %v939_v48 = vpop.f32.mrf.mxu3 }
 0x3bb   : > { %v1872_v49 = vadd.f32 %v1448_v33, %v939_v48 }
 0x3bc   : > { %v922_v50 = vpop.f32.mrf.mxu1 }
 0x3bd   : > { %v923_v51 = vadd.f32 %v1448_v33, %v922_v50 }
 0x3c2   : > { %v942_v52 = vpop.f32.mrf.mxu3 }
 0x3c3   : > { %v943_v53 = vadd.f32 %v1448_v33, %v942_v52 }
 0x3c4   : > { %v924_v54 = vpop.f32.mrf.mxu1 }
 0x3c5   : > { %v925_v55 = vadd.f32 %v1448_v33, %v924_v54 }
 0x3ca   : > { %v944_v56 = vpop.f32.mrf.mxu3 }
 0x3cb   : > { %v945_v57 = vadd.f32 %v1448_v33, %v944_v56 }
 0x3cc   : > { %v927_v58 = vpop.f32.mrf.mxu1 }
 0x3cd   : > { %v928_v59 = vadd.f32 %v1448_v33, %v927_v58 }
 0x3d2   : > { %v947_v60 = vpop.f32.mrf.mxu3 }
 0x3d3   : > { %v948_v61 = vadd.f32 %v1448_v33, %v947_v60 }
 0x3d4   : > { %v929_v62 = vpop.f32.mrf.mxu1 }
 0x3d5   : > { %v930_v63 = vadd.f32 %v1448_v33, %v929_v62 }
 0x3d7   : > { %955 = sbr.rel (%p1287_p1) target bundleno = 1006 (0x3ee), region = 80 }
 0x3da   : > { %v949_v0 = vpop.f32.mrf.mxu3 }
 0x3db   : > { %v950_v1 = vadd.f32 %v1448_v33, %v949_v0 }
 0x3dc   : > { %v956_v2 = vmax.f32 %v1862_v35, 0.0  ;;  %v957_v3 = vmax.f32 %v1866_v39, 0.0  ;;  %v958_v4 = vmax.f32 %v918_v43, 0.0  ;;  %v959_v5 = vmax.f32 %v920_v47, 0.0 }
 0x3dd   : > { %v960_v6 = vmax.f32 %v923_v51, 0.0  ;;  %v961_v7 = vmax.f32 %v925_v55, 0.0  ;;  %v962_v8 = vmax.f32 %v928_v59, 0.0  ;;  %v963_v9 = vmax.f32 %v930_v63, 0.0 }
 0x3de   : > { %972 = vst [vmem:[#allocation10] sm:$0xff] %v956_v2  ;;  %v964_v10 = vmax.f32 %v1864_v37, 0.0  ;;  %v965_v11 = vmax.f32 %v1868_v41, 0.0  ;;  %v966_v12 = vmax.f32 %v1870_v45, 0.0  ;;  %v967_v13 = vmax.f32 %v1872_v49, 0.0 }
 0x3df   : > { %973 = vst [vmem:[#allocation10 + $0x8] sm:$0xff] %v957_v3  ;;  %v968_v14 = vmax.f32 %v943_v53, 0.0  ;;  %v969_v15 = vmax.f32 %v945_v57, 0.0  ;;  %v970_v16 = vmax.f32 %v948_v61, 0.0  ;;  %v971_v17 = vmax.f32 %v950_v1, 0.0 }
 0x3e0   : > { %974 = vst [vmem:[#allocation10 + $0x10] sm:$0xff] %v958_v4 }
 0x3e1   : > { %975 = vst [vmem:[#allocation10 + $0x18] sm:$0xff] %v959_v5 }
 0x3e2   : > { %976 = vst [vmem:[#allocation10 + $0x20] sm:$0xff] %v960_v6 }
 0x3e3   : > { %977 = vst [vmem:[#allocation10 + $0x28] sm:$0xff] %v961_v7 }
 0x3e4   : > { %978 = vst [vmem:[#allocation10 + $0x30] sm:$0xff] %v962_v8 }
 0x3e5   : > { %979 = vst [vmem:[#allocation10 + $0x38] sm:$0xff] %v963_v9 }
 0x3e6   : > { %980 = vst [vmem:[#allocation10 + $0x40] sm:$0xff] %v964_v10 }
 0x3e7   : > { %981 = vst [vmem:[#allocation10 + $0x48] sm:$0xff] %v965_v11 }
 0x3e8   : > { %982 = vst [vmem:[#allocation10 + $0x50] sm:$0xff] %v966_v12 }
 0x3e9   : > { %983 = vst [vmem:[#allocation10 + $0x58] sm:$0xff] %v967_v13 }
 0x3ea   : > { %984 = vst [vmem:[#allocation10 + $0x60] sm:$0xff] %v968_v14 }
 0x3eb   : > { %985 = vst [vmem:[#allocation10 + $0x68] sm:$0xff] %v969_v15 }
 0x3ec   : > { %986 = vst [vmem:[#allocation10 + $0x70] sm:$0xff] %v970_v16 }
 0x3ed   : > { %987 = vst [vmem:[#allocation10 + $0x78] sm:$0xff] %v971_v17 }
 0x3ee PF: > { %p1288_p13 = scmp.ne.s32.totalorder %s1707_s25, 2 }
 0x3f0   : > { %991 = sbr.rel (%p1288_p13) target bundleno = 1029 (0x405), region = 84 }
 0x3f5   : > { %992 = vst [vmem:[#allocation10] sm:$0xff] %v1862_v35 }
 0x3f6   : > { %993 = vst [vmem:[#allocation10 + $0x8] sm:$0xff] %v1866_v39 }
 0x3f7   : > { %994 = vst [vmem:[#allocation10 + $0x10] sm:$0xff] %v918_v43 }
 0x3f8   : > { %995 = vst [vmem:[#allocation10 + $0x18] sm:$0xff] %v920_v47 }
 0x3f9   : > { %996 = vst [vmem:[#allocation10 + $0x20] sm:$0xff] %v923_v51 }
 0x3fa   : > { %997 = vst [vmem:[#allocation10 + $0x28] sm:$0xff] %v925_v55 }
 0x3fb   : > { %998 = vst [vmem:[#allocation10 + $0x30] sm:$0xff] %v928_v59 }
 0x3fc   : > { %999 = vst [vmem:[#allocation10 + $0x38] sm:$0xff] %v930_v63 }
 0x3fd   : > { %1000 = vst [vmem:[#allocation10 + $0x40] sm:$0xff] %v1864_v37 }
 0x3fe   : > { %1001 = vst [vmem:[#allocation10 + $0x48] sm:$0xff] %v1868_v41 }
 0x3ff   : > { %1002 = vst [vmem:[#allocation10 + $0x50] sm:$0xff] %v1870_v45 }
 0x400   : > { %1003 = vst [vmem:[#allocation10 + $0x58] sm:$0xff] %v1872_v49 }
 0x401   : > { %1004 = vst [vmem:[#allocation10 + $0x60] sm:$0xff] %v943_v53 }
 0x402   : > { %1005 = vst [vmem:[#allocation10 + $0x68] sm:$0xff] %v945_v57 }
 0x403   : > { %1006 = vst [vmem:[#allocation10 + $0x70] sm:$0xff] %v948_v61 }
 0x404   : > { %1007 = vst [vmem:[#allocation10 + $0x78] sm:$0xff] %v950_v1 }
 0x405 PF: > { %p1405_p0 = scmp.eq.s32.totalorder %s1707_s25, 2  ;;  %s1015_s24 = sshll.u32 %s1911_s6, 4  ;;  %s1016_s24 = int_to_ptr.hbm [resolvable:$true] %s1015_s24 }
 0x406   : > { %s1650_s30 = smov [#allocation10]   ;;  %s1651_s11 = smov 128  }
 0x407   : > { %s1013_s10 = sshll.u32 %s1650_s30, 4  ;;  %s1652_s12 = smov 8   ;;  %s1014_s10 = int_to_ptr.vmem [resolvable:$true] %s1013_s10 }
 0x408   : > { %1381 = dma.vmem_to_hbm [thread:$0]  (%p1405_p0), %s1014_s10, 2048, %s1016_s24, [#allocation4], %s1651_s11, %s1651_s11, %s1652_s12  }
 0x409   : > { %1626 = dma.done.wait (%p1405_p0), [#allocation4], 2048  }
 0x40a   : > { %1628 = vsyncadd (%p1405_p0), [#allocation4], 4294965248 }
 0x40b PF: > { %p19_p2 = scmp.ge.s32.totalorder %s1752_s28, 5   ;;  %s1916_s21 = smov %s1635_s22 }
 0x40c   : > { %s1917_s22 = smov %s1639_s23  ;;  %s1918_s23 = smov %s1767_s7 }
 0x40d   : > { %s1919_s24 = smov %s1752_s28  ;;  %21 = sbr.rel (!%p19_p2) target bundleno = 6 (0x6), region = 121 }
 0x412   :  { %1032 = vsyncpa [#allocation3], 1 }
 0x413   :  { %1034 = vsyncpa [#allocation3 + $0x1], 1 }
 0x414   :  { %1035 = vsyncpa [#allocation6], 1 }
 0x415   :  { %1036 = vsyncpa [#allocation9], 1 }
 0x416   :  { %1038 = vsyncpa [#allocation9 + $0x1], 1 }
 0x417   :  { %1039 = vsyncpa [#allocation4], 1 }
 0x418   :  { %1041 = vsyncpa [#allocation4 + $0x1], 1 }

// kernel: tpu_custom_call.1
= control target key start
LH: loop header
LB: loop body
LE: loop exit
PB: predicated region body
PF: predicated region fallthrough
CT: control target
= control target key end

     0   :  { %11 = vsyncpa [#allocation3], 0  ;;  %s1905_s0 = inlined_call_operand.hbm [shape: bf16[128,128], index: 0, kind: input, shape index: {}]   ;;  %s1906_s1 = inlined_call_operand.hbm [shape: bf16[128,128], index: 1, kind: input, shape index: {}]   ;;  %s1907_s2 = inlined_call_operand.hbm [shape: bf16[128,128], index: 2, kind: input, shape index: {}]   ;;  %s1908_s3 = inlined_call_operand.vmem [shape: f32[1,128], index: 3, kind: input, shape index: {}]   ;;  %s1909_s4 = inlined_call_operand.hbm [shape: bf16[3,128,128], index: 4, kind: input, shape index: {}]   ;;  %s1910_s5 = inlined_call_operand.vmem [shape: f32[3,1,128], index: 5, kind: input, shape index: {}]   ;;  %s1911_s6 = inlined_call_operand.hbm [shape: f32[128,128], index: 6, kind: output, shape index: {}]  }
   0x1   :  { %12 = vsyncpa [#allocation6], 0 }
   0x2   :  { %13 = vsyncpa [#allocation9], 0 }
   0x3   :  { %15 = vsyncpa [#allocation9 + $0x1], 0 }
   0x4   :  { %16 = vsyncpa [#allocation4], 0  ;;  %s1688_s21 = smov 0   ;;  %s1690_s22 = smov 0  }
   0x5   :  { %s1692_s23 = smov 0   ;;  %s1694_s24 = smov 0  }
   0x6 LB: > { %s1707_s25 = sadd.s32 4294967295, %s1643_s24   ;;  %p126_p0 = scmp.ne.s32.totalorder %s1635_s22, %s1631_s21  ;;  %s1643_s24 = sphi %s1694_s24, %s1919_s24   ;;  %s1639_s23 = sphi %s1692_s23, %s1918_s23   ;;  %s1635_s22 = sphi %s1690_s22, %s1917_s22   ;;  %s1631_s21 = sphi %s1688_s21, %s1916_s21  }
   0x7   : > { %p127_p1 = scmp.eq.s32.totalorder %s1707_s25, 0  ;;  %p1110_p2 = scmp.ge.s32.totalorder %s1643_s24, 1 }
   0x8   : > { %p184_p3 = scmp.lt.s32.totalorder %s1643_s24, 4  ;;  %p1111_p4 = scmp.ne.s32.totalorder %s1707_s25, 0 }
   0x9   : > { %p1716_p5 = por %p127_p1, %p126_p0  ;;  %s209_s30 = sshll.u32 %s1906_s1, 4  ;;  %s210_s30 = int_to_ptr.hbm [resolvable:$true] %s209_s30 }
   0xa   : > { %p1720_p6 = pnand %p1110_p2, %p184_p3  ;;  %s1645_s7 = smov [#allocation5]  }
   0xb   : > { %s211_s8 = sshll.u32 %s1645_s7, 4  ;;  %s195_s12 = sshll.u32 %s1905_s0, 4  ;;  %s212_s8 = int_to_ptr.vmem [resolvable:$true] %s211_s8  ;;  %s196_s12 = int_to_ptr.hbm [resolvable:$true] %s195_s12 }
   0xc   : > { %p1384_p7 = pneg %p1720_p6  ;;  %s1646_s13 = smov 64  }
   0xd   : > { %s1647_s14 = smov 4   ;;  %s1648_s15 = smov [#allocation2]  }
   0xe   : > { %p1731_p8 = pnand %p1384_p7, %p127_p1  ;;  %s197_s16 = sshll.u32 %s1648_s15, 4  ;;  %s198_s16 = int_to_ptr.vmem [resolvable:$true] %s197_s16 }
   0xf   : > { %s223_s19 = sshll.u32 %s1907_s2, 4  ;;  %s1649_s20 = smov [#allocation7]   ;;  %s224_s19 = int_to_ptr.hbm [resolvable:$true] %s223_s19 }
  0x10   : > { %1390 = dma.hbm_to_vmem [thread:$0]  (!%p1731_p8), %s210_s30, 1024, %s212_s8, [#allocation6], %s1646_s13, %s1646_s13, %s1647_s14  }
  0x11   : > { %1387 = dma.hbm_to_vmem [thread:$0]  (!%p1731_p8), %s196_s12, 1024, %s198_s16, [#allocation3], %s1646_s13, %s1646_s13, %s1647_s14  }
  0x12   : > { %s225_s21 = sshll.u32 %s1649_s20, 4  ;;  %s1752_s28 = sadd.s32 1, %s1643_s24   ;;  %s226_s21 = int_to_ptr.vmem [resolvable:$true] %s225_s21 }
  0x13   : > { %1393 = dma.hbm_to_vmem [thread:$0]  (!%p1731_p8), %s224_s19, 1024, %s226_s21, [#allocation6], %s1646_s13, %s1646_s13, %s1647_s14  }
  0x14   : > { %s110_s29 = ssub.s32 %s1643_s24, %s1752_s28  ;;  %s113_s30 = sadd.s32 1, %s1639_s23 }
  0x15   : > { %p111_p9 = scmp.eq.s32.totalorder %s110_s29, 0  ;;  %p120_p10 = scmp.ne.s32.totalorder %s1639_s23, %s1635_s22 }
  0x16   : > { %p121_p11 = scmp.eq.s32.totalorder %s1643_s24, 0  ;;  %p1401_p12 = scmp.lt.s32.totalorder %s1643_s24, 3 }
  0x17   : > { %s1767_s7 = scalar_select %p111_p9, %s1639_s23, %s113_s30  }
  0x18   : > { %p122_p13 = por %p121_p11, %p120_p10  ;;  %s242_s8 = sand.u32 1, %s1639_s23  }
  0x19   : > { %s1115_s10 = sshll.u32 %s242_s8, 6  ;;  %s1293_s11 = sshll.u32 %s1643_s24, 6 }
  0x1a   : > { %s251_s9 = scalar_lea.hbm %s1909_s4, %s1293_s11  ;;  %s246_s16 = scalar_lea.vmem [#allocation8], %s1115_s10 }
  0x1b   : > { %s254_s17 = sshll.u32 %s246_s16, 4  ;;  %s252_s18 = sshll.u32 %s251_s9, 4  ;;  %s255_s17 = int_to_ptr.vmem [resolvable:$true] %s254_s17  ;;  %s253_s18 = int_to_ptr.hbm [resolvable:$true] %s252_s18 }
  0x1c   : > { %p1774_p0 = pnand %p1401_p12, %p122_p13  ;;  %s243_s20 = scalar_lea.sflag [#allocation9], %s242_s8 }
  0x1d   : > { %s1539_s21 = sshra.s32 %s253_s18, 4  ;;  %s1546_s10 = scalar_lea.hbm %s1909_s4, 192  ;;  %s1540_s21 = int_to_ptr.hbm [resolvable:$true] %s1539_s21 }
  0x1e   : > { %s1541_s29 = scalar_lea.hbm %s1540_s21, 64  ;;  %p1543_p3 = pneg %p1774_p0 }
  0x1f   : > { %p1542_p2 = scmp.ne.s32.totalorder %s1540_s21, %s1541_s29  ;;  %p1547_p9 = scmp.lt.s32.totalorder %s1540_s21, %s1909_s4 }
  0x20   : > { %p1548_p10 = scmp.lt.s32.totalorder %s1546_s10, %s1541_s29 }
  0x21   : > { %p1544_p7 = pnand %p1543_p3, %p1542_p2 }
  0x22   : > { %p1549_p11 = por %p1548_p10, %p1547_p9 }
  0x23   : > { %p1545_p8 = pneg %p1544_p7 }
  0x25   : > { %p1550_p12 = pnand %p1549_p11, %p1545_p8 }
  0x27   : > { %1553 = shalt.err (!%p1550_p12)
}
  0x28   : > { %1397 = dma.hbm_to_vmem [thread:$0]  (!%p1774_p0), %s253_s18, 1024, %s255_s17, %s243_s20, %s1646_s13, %s1646_s13, %s1647_s14  }
  0x29   : > { %272 = sbr.rel (%p1720_p6) target bundleno = 1035 (0x40b), region = 44 }
  0x2e   : > { %1614 = dma.done.wait (%p127_p1), [#allocation3], 1024  }
  0x2f   : > { %1616 = vsyncadd (%p127_p1), [#allocation3], 4294966272 }
  0x30   : > { %1618 = dma.done.wait (%p127_p1), [#allocation6], 2048  }
  0x31   : > { %1620 = vsyncadd (%p127_p1), [#allocation6], 4294965248  ;;  %s289_s8 = sand.u32 1, %s1635_s22  }
  0x32   : > { %s1122_s15 = sshll.u32 %s289_s8, 6  ;;  %s290_s13 = scalar_lea.sflag [#allocation9], %s289_s8 }
  0x33   : > { %s1802_s14 = scalar_lea.vmem [#allocation8], %s1122_s15 }
  0x34   : > { %1622 = dma.done.wait (%p1716_p5), %s290_s13, 1024  }
  0x35   : > { %1624 = vsyncadd (%p1716_p5), %s290_s13, 4294966272  ;;  %p321_p6 = scmp.lt.s32.totalorder %s1707_s25, 2  ;;  %327 = sbr.rel (%p1111_p4) target bundleno = 541 (0x21d), region = 64 }
  0x36   : > { %p1220_p4 = scmp.eq.s32.totalorder (!%p1111_p4), %s1707_s25, 2 }
  0x37   : > { %s1810_s27 = scalar_select %p321_p6, %s1707_s25, 2 }
  0x39   : > { %s323_s17 = scalar_lea.vmem %s1910_s5, %s1810_s27 }
  0x3a   : > { %v1309_v0 = vld [vmem:[#allocation7 + $0x38] sm:$0xff]  ;;  %v1308_v1 = vld [vmem:[#allocation7 + $0x30] sm:$0xff]  ;;  %v1307_v2 = vld [vmem:[#allocation7 + $0x28] sm:$0xff] }
  0x3b   : > { %1334 = vmatpush.bf16.msra.mxu2 %v1309_v0  ;;  %457 = vmatpush.bf16.msra.mxu0 %v1309_v0  ;;  %v1306_v3 = vld [vmem:[#allocation7 + $0x20] sm:$0xff]  ;;  %v1305_v4 = vld [vmem:[#allocation7 + $0x18] sm:$0xff]  ;;  %v1304_v5 = vld [vmem:[#allocation7 + $0x10] sm:$0xff] }
  0x3c   : > { %v1303_v6 = vld [vmem:[#allocation7 + $0x8] sm:$0xff]  ;;  %v1302_v7 = vld [vmem:[#allocation7] sm:$0xff]  ;;  %v1300_v12 = vld [vmem:[#allocation5 + $0x30] sm:$0xff] }
  0x3d   : > { %v1298_v8 = vld [vmem:[#allocation5 + $0x20] sm:$0xff]  ;;  %v1299_v10 = vld [vmem:[#allocation5 + $0x28] sm:$0xff]  ;;  %v1296_v13 = vld [vmem:[#allocation5 + $0x10] sm:$0xff] }
  0x3e   : > { %v1294_v9 = vld [vmem:[#allocation5] sm:$0xff]  ;;  %v1295_v11 = vld [vmem:[#allocation5 + $0x8] sm:$0xff]  ;;  %v1301_v14 = vld [vmem:[#allocation5 + $0x38] sm:$0xff] }
  0x3f   : > { %1335 = vmatpush.bf16.msra.mxu2 %v1308_v1  ;;  %458 = vmatpush.bf16.msra.mxu0 %v1308_v1  ;;  %v1297_v15 = vld [vmem:[#allocation5 + $0x18] sm:$0xff]  ;;  %v1310_v40 = vld [vmem:[#allocation2] sm:$0xff]  ;;  %v1311_v42 = vld [vmem:[#allocation2 + $0x8] sm:$0xff] }
  0x40   : > { %v1314_v41 = vld [vmem:[#allocation2 + $0x20] sm:$0xff]  ;;  %v1315_v43 = vld [vmem:[#allocation2 + $0x28] sm:$0xff]  ;;  %v1312_v44 = vld [vmem:[#allocation2 + $0x10] sm:$0xff] }
  0x41   : > { %v1316_v45 = vld [vmem:[#allocation2 + $0x30] sm:$0xff]  ;;  %v1313_v46 = vld [vmem:[#allocation2 + $0x18] sm:$0xff]  ;;  %v1447_v48 = vld [vmem:[%s1908_s3] ss:$0 sm:$0xff] }
  0x42   : > { %v1317_v47 = vld [vmem:[#allocation2 + $0x38] sm:$0xff] }
  0x43   : > { %1336 = vmatpush.bf16.msra.mxu2 %v1307_v2  ;;  %459 = vmatpush.bf16.msra.mxu0 %v1307_v2 }
  0x47   : > { %1337 = vmatpush.bf16.msra.mxu2 %v1306_v3  ;;  %460 = vmatpush.bf16.msra.mxu0 %v1306_v3 }
  0x4b   : > { %1338 = vmatpush.bf16.msra.mxu2 %v1305_v4  ;;  %461 = vmatpush.bf16.msra.mxu0 %v1305_v4 }
  0x4f   : > { %1339 = vmatpush.bf16.msra.mxu2 %v1304_v5  ;;  %462 = vmatpush.bf16.msra.mxu0 %v1304_v5 }
  0x53   : > { %1340 = vmatpush.bf16.msra.mxu2 %v1303_v6  ;;  %463 = vmatpush.bf16.msra.mxu0 %v1303_v6 }
  0x57   : > { %1341 = vmatpush.bf16.msra.mxu2 %v1302_v7  ;;  %464 = vmatpush.bf16.msra.mxu0 %v1302_v7 }
  0x5a   : > { %485 = vmatmul.bf16.vlgmr.msra.gmra.mxu2 %v1298_v8  ;;  %465 = vmatmul.bf16.vlgmr.msra.gmra.mxu0 %v1294_v9 }
  0x6a   : > { %490 = vmatmul.bf16.gmra.mxu2 %v1299_v10  ;;  %470 = vmatmul.bf16.gmra.mxu0 %v1295_v11 }
  0x7a   : > { %495 = vmatmul.bf16.gmra.mxu2 %v1300_v12  ;;  %475 = vmatmul.bf16.gmra.mxu0 %v1296_v13 }
  0x8a   : > { %500 = vmatmul.bf16.gmra.mxu2 %v1301_v14  ;;  %480 = vmatmul.bf16.gmra.mxu0 %v1297_v15 }
  0xd7   : > { %v466_v17 = vpop.f32.mrf.mxu0 }
  0xdd   : > { %v486_v16 = vpop.f32.mrf.mxu2 }
  0xdf   : > { %v468_v19 = vpop.f32.mrf.mxu0 }
  0xe0   : > { %v522_v39 = vpack.c.bf16 %v468_v19, %v466_v17 }
  0xe5   : > { %v488_v18 = vpop.f32.mrf.mxu2 }
  0xe6   : > { %v526_v34 = vpack.c.bf16 %v488_v18, %v486_v16 }
  0xe7   : > { %v471_v21 = vpop.f32.mrf.mxu0 }
  0xed   : > { %v491_v20 = vpop.f32.mrf.mxu2 }
  0xef   : > { %v473_v23 = vpop.f32.mrf.mxu0 }
  0xf0   : > { %v523_v38 = vpack.c.bf16 %v473_v23, %v471_v21 }
  0xf5   : > { %v493_v22 = vpop.f32.mrf.mxu2 }
  0xf6   : > { %v527_v33 = vpack.c.bf16 %v493_v22, %v491_v20 }
  0xf7   : > { %v476_v25 = vpop.f32.mrf.mxu0 }
  0xfd   : > { %v496_v24 = vpop.f32.mrf.mxu2 }
  0xff   : > { %v478_v28 = vpop.f32.mrf.mxu0 }
 0x100   : > { %v524_v37 = vpack.c.bf16 %v478_v28, %v476_v25 }
 0x105   : > { %v498_v26 = vpop.f32.mrf.mxu2 }
 0x106   : > { %v528_v32 = vpack.c.bf16 %v498_v26, %v496_v24 }
 0x107   : > { %v481_v31 = vpop.f32.mrf.mxu0 }
 0x10d   : > { %v501_v27 = vpop.f32.mrf.mxu2 }
 0x10f   : > { %v483_v35 = vpop.f32.mrf.mxu0 }
 0x110   : > { %v525_v36 = vpack.c.bf16 %v483_v35, %v481_v31 }
 0x115   : > { %v503_v29 = vpop.f32.mrf.mxu2 }
 0x116   : > { %v529_v30 = vpack.c.bf16 %v503_v29, %v501_v27 }
 0x118   : > { %581 = vmatpush.bf16.msra.mxu1 %v529_v30  ;;  %1342 = vmatpush.bf16.msra.mxu3 %v529_v30 }
 0x11c   : > { %582 = vmatpush.bf16.msra.mxu1 %v528_v32  ;;  %1343 = vmatpush.bf16.msra.mxu3 %v528_v32 }
 0x120   : > { %583 = vmatpush.bf16.msra.mxu1 %v527_v33  ;;  %1344 = vmatpush.bf16.msra.mxu3 %v527_v33 }
 0x124   : > { %584 = vmatpush.bf16.msra.mxu1 %v526_v34  ;;  %1345 = vmatpush.bf16.msra.mxu3 %v526_v34 }
 0x128   : > { %585 = vmatpush.bf16.msra.mxu1 %v525_v36  ;;  %1346 = vmatpush.bf16.msra.mxu3 %v525_v36 }
 0x12c   : > { %586 = vmatpush.bf16.msra.mxu1 %v524_v37  ;;  %1347 = vmatpush.bf16.msra.mxu3 %v524_v37 }
 0x130   : > { %587 = vmatpush.bf16.msra.mxu1 %v523_v38  ;;  %1348 = vmatpush.bf16.msra.mxu3 %v523_v38 }
 0x134   : > { %588 = vmatpush.bf16.msra.mxu1 %v522_v39  ;;  %1349 = vmatpush.bf16.msra.mxu3 %v522_v39 }
 0x137   : > { %589 = vmatmul.bf16.vlgmr.msra.gmra.mxu1 %v1310_v40  ;;  %609 = vmatmul.bf16.vlgmr.msra.gmra.mxu3 %v1314_v41 }
 0x147   : > { %594 = vmatmul.bf16.gmra.mxu1 %v1311_v42  ;;  %614 = vmatmul.bf16.gmra.mxu3 %v1315_v43 }
 0x157   : > { %599 = vmatmul.bf16.gmra.mxu1 %v1312_v44  ;;  %619 = vmatmul.bf16.gmra.mxu3 %v1316_v45 }
 0x167   : > { %604 = vmatmul.bf16.gmra.mxu1 %v1313_v46  ;;  %624 = vmatmul.bf16.gmra.mxu3 %v1317_v47 }
 0x1b4   : > { %v590_v49 = vpop.f32.mrf.mxu1 }
 0x1b5   : > { %v1821_v50 = vadd.f32 %v1447_v48, %v590_v49 }
 0x1ba   : > { %v610_v51 = vpop.f32.mrf.mxu3 }
 0x1bb   : > { %v1823_v52 = vadd.f32 %v1447_v48, %v610_v51 }
 0x1bc   : > { %v592_v53 = vpop.f32.mrf.mxu1 }
 0x1bd   : > { %v1825_v54 = vadd.f32 %v1447_v48, %v592_v53 }
 0x1c2   : > { %v612_v55 = vpop.f32.mrf.mxu3 }
 0x1c3   : > { %v1827_v56 = vadd.f32 %v1447_v48, %v612_v55 }
 0x1c4   : > { %v595_v57 = vpop.f32.mrf.mxu1 }
 0x1c5   : > { %v596_v58 = vadd.f32 %v1447_v48, %v595_v57 }
 0x1ca   : > { %v615_v59 = vpop.f32.mrf.mxu3 }
 0x1cb   : > { %v1829_v60 = vadd.f32 %v1447_v48, %v615_v59 }
 0x1cc   : > { %v597_v61 = vpop.f32.mrf.mxu1 }
 0x1cd   : > { %v598_v62 = vadd.f32 %v1447_v48, %v597_v61 }
 0x1d2   : > { %v617_v63 = vpop.f32.mrf.mxu3 }
 0x1d3   : > { %v1831_v0 = vadd.f32 %v1447_v48, %v617_v63 }
 0x1d4   : > { %v600_v1 = vpop.f32.mrf.mxu1 }
 0x1d5   : > { %v601_v2 = vadd.f32 %v1447_v48, %v600_v1 }
 0x1da   : > { %v620_v3 = vpop.f32.mrf.mxu3 }
 0x1db   : > { %v621_v4 = vadd.f32 %v1447_v48, %v620_v3 }
 0x1dc   : > { %v602_v5 = vpop.f32.mrf.mxu1 }
 0x1dd   : > { %v603_v6 = vadd.f32 %v1447_v48, %v602_v5 }
 0x1e2   : > { %v622_v7 = vpop.f32.mrf.mxu3 }
 0x1e3   : > { %v623_v8 = vadd.f32 %v1447_v48, %v622_v7 }
 0x1e4   : > { %v605_v9 = vpop.f32.mrf.mxu1 }
 0x1e5   : > { %v606_v10 = vadd.f32 %v1447_v48, %v605_v9 }
 0x1ea   : > { %v625_v11 = vpop.f32.mrf.mxu3 }
 0x1eb   : > { %v626_v12 = vadd.f32 %v1447_v48, %v625_v11 }
 0x1ec   : > { %v607_v13 = vpop.f32.mrf.mxu1 }
 0x1ed   : > { %v608_v14 = vadd.f32 %v1447_v48, %v607_v13 }
 0x1ef   : > { %633 = sbr.rel (%p1220_p4) target bundleno = 518 (0x206), region = 68 }
 0x1f2   : > { %v627_v15 = vpop.f32.mrf.mxu3 }
 0x1f3   : > { %v628_v16 = vadd.f32 %v1447_v48, %v627_v15 }
 0x1f4   : > { %v634_v17 = vmax.f32 %v1821_v50, 0.0  ;;  %v635_v18 = vmax.f32 %v1825_v54, 0.0  ;;  %v636_v19 = vmax.f32 %v596_v58, 0.0  ;;  %v637_v20 = vmax.f32 %v598_v62, 0.0 }
 0x1f5   : > { %v638_v21 = vmax.f32 %v601_v2, 0.0  ;;  %v639_v22 = vmax.f32 %v603_v6, 0.0  ;;  %v640_v23 = vmax.f32 %v606_v10, 0.0  ;;  %v641_v24 = vmax.f32 %v608_v14, 0.0 }
 0x1f6   : > { %650 = vst [vmem:[#allocation10] sm:$0xff] %v634_v17  ;;  %v642_v25 = vmax.f32 %v1823_v52, 0.0  ;;  %v643_v26 = vmax.f32 %v1827_v56, 0.0  ;;  %v644_v27 = vmax.f32 %v1829_v60, 0.0  ;;  %v645_v28 = vmax.f32 %v1831_v0, 0.0 }
 0x1f7   : > { %651 = vst [vmem:[#allocation10 + $0x8] sm:$0xff] %v635_v18  ;;  %v646_v29 = vmax.f32 %v621_v4, 0.0  ;;  %v647_v30 = vmax.f32 %v623_v8, 0.0  ;;  %v648_v31 = vmax.f32 %v626_v12, 0.0  ;;  %v649_v32 = vmax.f32 %v628_v16, 0.0 }
 0x1f8   : > { %652 = vst [vmem:[#allocation10 + $0x10] sm:$0xff] %v636_v19 }
 0x1f9   : > { %653 = vst [vmem:[#allocation10 + $0x18] sm:$0xff] %v637_v20 }
 0x1fa   : > { %654 = vst [vmem:[#allocation10 + $0x20] sm:$0xff] %v638_v21 }
 0x1fb   : > { %655 = vst [vmem:[#allocation10 + $0x28] sm:$0xff] %v639_v22 }
 0x1fc   : > { %656 = vst [vmem:[#allocation10 + $0x30] sm:$0xff] %v640_v23 }
 0x1fd   : > { %657 = vst [vmem:[#allocation10 + $0x38] sm:$0xff] %v641_v24 }
 0x1fe   : > { %658 = vst [vmem:[#allocation10 + $0x40] sm:$0xff] %v642_v25 }
 0x1ff   : > { %659 = vst [vmem:[#allocation10 + $0x48] sm:$0xff] %v643_v26 }
 0x200   : > { %660 = vst [vmem:[#allocation10 + $0x50] sm:$0xff] %v644_v27 }
 0x201   : > { %661 = vst [vmem:[#allocation10 + $0x58] sm:$0xff] %v645_v28 }
 0x202   : > { %662 = vst [vmem:[#allocation10 + $0x60] sm:$0xff] %v646_v29 }
 0x203   : > { %663 = vst [vmem:[#allocation10 + $0x68] sm:$0xff] %v647_v30 }
 0x204   : > { %664 = vst [vmem:[#allocation10 + $0x70] sm:$0xff] %v648_v31 }
 0x205   : > { %665 = vst [vmem:[#allocation10 + $0x78] sm:$0xff] %v649_v32 }
 0x206 PF: > { %p1221_p5 = scmp.ne.s32.totalorder %s1707_s25, 2 }
 0x208   : > { %669 = sbr.rel (%p1221_p5) target bundleno = 541 (0x21d), region = 72 }
 0x20d   : > { %670 = vst [vmem:[#allocation10] sm:$0xff] %v1821_v50 }
 0x20e   : > { %671 = vst [vmem:[#allocation10 + $0x8] sm:$0xff] %v1825_v54 }
 0x20f   : > { %672 = vst [vmem:[#allocation10 + $0x10] sm:$0xff] %v596_v58 }
 0x210   : > { %673 = vst [vmem:[#allocation10 + $0x18] sm:$0xff] %v598_v62 }
 0x211   : > { %674 = vst [vmem:[#allocation10 + $0x20] sm:$0xff] %v601_v2 }
 0x212   : > { %675 = vst [vmem:[#allocation10 + $0x28] sm:$0xff] %v603_v6 }
 0x213   : > { %676 = vst [vmem:[#allocation10 + $0x30] sm:$0xff] %v606_v10 }
 0x214   : > { %677 = vst [vmem:[#allocation10 + $0x38] sm:$0xff] %v608_v14 }
 0x215   : > { %678 = vst [vmem:[#allocation10 + $0x40] sm:$0xff] %v1823_v52 }
 0x216   : > { %679 = vst [vmem:[#allocation10 + $0x48] sm:$0xff] %v1827_v56 }
 0x217   : > { %680 = vst [vmem:[#allocation10 + $0x50] sm:$0xff] %v1829_v60 }
 0x218   : > { %681 = vst [vmem:[#allocation10 + $0x58] sm:$0xff] %v1831_v0 }
 0x219   : > { %682 = vst [vmem:[#allocation10 + $0x60] sm:$0xff] %v621_v4 }
 0x21a   : > { %683 = vst [vmem:[#allocation10 + $0x68] sm:$0xff] %v623_v8 }
 0x21b   : > { %684 = vst [vmem:[#allocation10 + $0x70] sm:$0xff] %v626_v12 }
 0x21c   : > { %685 = vst [vmem:[#allocation10 + $0x78] sm:$0xff] %v628_v16 }
 0x21d PF: > { %689 = sbr.rel (%p127_p1) target bundleno = 1029 (0x405), region = 76  ;;  %p1287_p1 = scmp.eq.s32.totalorder (!%p127_p1), %s1707_s25, 2 }
 0x222   : > { %v1325_v33 = vld [vmem:[%s1802_s14 + $0x38] sm:$0xff]  ;;  %v1324_v34 = vld [vmem:[%s1802_s14 + $0x30] sm:$0xff]  ;;  %v1323_v35 = vld [vmem:[%s1802_s14 + $0x28] sm:$0xff] }
 0x223   : > { %1350 = vmatpush.bf16.msra.mxu2 %v1325_v33  ;;  %779 = vmatpush.bf16.msra.mxu0 %v1325_v33  ;;  %v1322_v36 = vld [vmem:[%s1802_s14 + $0x20] sm:$0xff]  ;;  %v1321_v37 = vld [vmem:[%s1802_s14 + $0x18] sm:$0xff]  ;;  %v1320_v38 = vld [vmem:[%s1802_s14 + $0x10] sm:$0xff] }
 0x224   : > { %v1319_v39 = vld [vmem:[%s1802_s14 + $0x8] sm:$0xff]  ;;  %v1318_v40 = vld [vmem:[%s1802_s14] sm:$0xff]  ;;  %v700_v47 = vld [vmem:[#allocation10 + $0x50] sm:$0xff] }
 0x225   : > { %v698_v41 = vld [vmem:[#allocation10 + $0x40] sm:$0xff]  ;;  %v699_v42 = vld [vmem:[#allocation10 + $0x48] sm:$0xff]  ;;  %v701_v48 = vld [vmem:[#allocation10 + $0x58] sm:$0xff] }
 0x226   : > { %v690_v43 = vld [vmem:[#allocation10] sm:$0xff]  ;;  %v691_v44 = vld [vmem:[#allocation10 + $0x8] sm:$0xff]  ;;  %v710_v45 = vpack.c.bf16 %v699_v42, %v698_v41  ;;  %v692_v49 = vld [vmem:[#allocation10 + $0x10] sm:$0xff]  ;;  %v711_v51 = vpack.c.bf16 %v701_v48, %v700_v47 }
 0x227   : > { %1351 = vmatpush.bf16.msra.mxu2 %v1324_v34  ;;  %780 = vmatpush.bf16.msra.mxu0 %v1324_v34  ;;  %v706_v46 = vpack.c.bf16 %v691_v44, %v690_v43  ;;  %v693_v50 = vld [vmem:[#allocation10 + $0x18] sm:$0xff]  ;;  %v702_v53 = vld [vmem:[#allocation10 + $0x60] sm:$0xff]  ;;  %v703_v54 = vld [vmem:[#allocation10 + $0x68] sm:$0xff] }
 0x228   : > { %v707_v52 = vpack.c.bf16 %v693_v50, %v692_v49  ;;  %v694_v55 = vld [vmem:[#allocation10 + $0x20] sm:$0xff]  ;;  %v695_v56 = vld [vmem:[#allocation10 + $0x28] sm:$0xff]  ;;  %v712_v57 = vpack.c.bf16 %v703_v54, %v702_v53  ;;  %v704_v59 = vld [vmem:[#allocation10 + $0x70] sm:$0xff] }
 0x229   : > { %v708_v58 = vpack.c.bf16 %v695_v56, %v694_v55  ;;  %v705_v60 = vld [vmem:[#allocation10 + $0x78] sm:$0xff]  ;;  %v696_v61 = vld [vmem:[#allocation10 + $0x30] sm:$0xff]  ;;  %v1326_v25 = vld [vmem:[#allocation2] sm:$0xff] }
 0x22a   : > { %v697_v62 = vld [vmem:[#allocation10 + $0x38] sm:$0xff]  ;;  %v713_v63 = vpack.c.bf16 %v705_v60, %v704_v59  ;;  %v1330_v26 = vld [vmem:[#allocation2 + $0x20] sm:$0xff]  ;;  %v1327_v27 = vld [vmem:[#allocation2 + $0x8] sm:$0xff] }
 0x22b   : > { %1352 = vmatpush.bf16.msra.mxu2 %v1323_v35  ;;  %781 = vmatpush.bf16.msra.mxu0 %v1323_v35  ;;  %v709_v0 = vpack.c.bf16 %v697_v62, %v696_v61  ;;  %v1331_v28 = vld [vmem:[#allocation2 + $0x28] sm:$0xff]  ;;  %v1328_v29 = vld [vmem:[#allocation2 + $0x10] sm:$0xff]  ;;  %v1329_v31 = vld [vmem:[#allocation2 + $0x18] sm:$0xff] }
 0x22c   : > { %v1332_v30 = vld [vmem:[#allocation2 + $0x30] sm:$0xff]  ;;  %v1333_v32 = vld [vmem:[#allocation2 + $0x38] sm:$0xff]  ;;  %v1448_v33 = vld [vmem:[%s323_s17] ss:$0 sm:$0xff] }
 0x22f   : > { %1353 = vmatpush.bf16.msra.mxu2 %v1322_v36  ;;  %782 = vmatpush.bf16.msra.mxu0 %v1322_v36 }
 0x233   : > { %1354 = vmatpush.bf16.msra.mxu2 %v1321_v37  ;;  %783 = vmatpush.bf16.msra.mxu0 %v1321_v37 }
 0x237   : > { %1355 = vmatpush.bf16.msra.mxu2 %v1320_v38  ;;  %784 = vmatpush.bf16.msra.mxu0 %v1320_v38 }
 0x23b   : > { %1356 = vmatpush.bf16.msra.mxu2 %v1319_v39  ;;  %785 = vmatpush.bf16.msra.mxu0 %v1319_v39 }
 0x23f   : > { %1357 = vmatpush.bf16.msra.mxu2 %v1318_v40  ;;  %786 = vmatpush.bf16.msra.mxu0 %v1318_v40 }
 0x242   : > { %807 = vmatmul.bf16.vlgmr.msra.gmra.mxu2 %v710_v45  ;;  %787 = vmatmul.bf16.vlgmr.msra.gmra.mxu0 %v706_v46 }
 0x252   : > { %812 = vmatmul.bf16.gmra.mxu2 %v711_v51  ;;  %792 = vmatmul.bf16.gmra.mxu0 %v707_v52 }
 0x262   : > { %817 = vmatmul.bf16.gmra.mxu2 %v712_v57  ;;  %797 = vmatmul.bf16.gmra.mxu0 %v708_v58 }
 0x272   : > { %822 = vmatmul.bf16.gmra.mxu2 %v713_v63  ;;  %802 = vmatmul.bf16.gmra.mxu0 %v709_v0 }
 0x2bf   : > { %v788_v2 = vpop.f32.mrf.mxu0 }
 0x2c5   : > { %v808_v1 = vpop.f32.mrf.mxu2 }
 0x2c7   : > { %v790_v4 = vpop.f32.mrf.mxu0 }
 0x2c8   : > { %v844_v24 = vpack.c.bf16 %v790_v4, %v788_v2 }
 0x2cd   : > { %v810_v3 = vpop.f32.mrf.mxu2 }
 0x2ce   : > { %v848_v19 = vpack.c.bf16 %v810_v3, %v808_v1 }
 0x2cf   : > { %v793_v6 = vpop.f32.mrf.mxu0 }
 0x2d5   : > { %v813_v5 = vpop.f32.mrf.mxu2 }
 0x2d7   : > { %v795_v8 = vpop.f32.mrf.mxu0 }
 0x2d8   : > { %v845_v23 = vpack.c.bf16 %v795_v8, %v793_v6 }
 0x2dd   : > { %v815_v7 = vpop.f32.mrf.mxu2 }
 0x2de   : > { %v849_v18 = vpack.c.bf16 %v815_v7, %v813_v5 }
 0x2df   : > { %v798_v10 = vpop.f32.mrf.mxu0 }
 0x2e5   : > { %v818_v9 = vpop.f32.mrf.mxu2 }
 0x2e7   : > { %v800_v13 = vpop.f32.mrf.mxu0 }
 0x2e8   : > { %v846_v22 = vpack.c.bf16 %v800_v13, %v798_v10 }
 0x2ed   : > { %v820_v11 = vpop.f32.mrf.mxu2 }
 0x2ee   : > { %v850_v17 = vpack.c.bf16 %v820_v11, %v818_v9 }
 0x2ef   : > { %v803_v16 = vpop.f32.mrf.mxu0 }
 0x2f5   : > { %v823_v12 = vpop.f32.mrf.mxu2 }
 0x2f7   : > { %v805_v20 = vpop.f32.mrf.mxu0 }
 0x2f8   : > { %v847_v21 = vpack.c.bf16 %v805_v20, %v803_v16 }
 0x2fd   : > { %v825_v14 = vpop.f32.mrf.mxu2 }
 0x2fe   : > { %v851_v15 = vpack.c.bf16 %v825_v14, %v823_v12 }
 0x300   : > { %903 = vmatpush.bf16.msra.mxu1 %v851_v15  ;;  %1358 = vmatpush.bf16.msra.mxu3 %v851_v15 }
 0x304   : > { %904 = vmatpush.bf16.msra.mxu1 %v850_v17  ;;  %1359 = vmatpush.bf16.msra.mxu3 %v850_v17 }
 0x308   : > { %905 = vmatpush.bf16.msra.mxu1 %v849_v18  ;;  %1360 = vmatpush.bf16.msra.mxu3 %v849_v18 }
 0x30c   : > { %906 = vmatpush.bf16.msra.mxu1 %v848_v19  ;;  %1361 = vmatpush.bf16.msra.mxu3 %v848_v19 }
 0x310   : > { %907 = vmatpush.bf16.msra.mxu1 %v847_v21  ;;  %1362 = vmatpush.bf16.msra.mxu3 %v847_v21 }
 0x314   : > { %908 = vmatpush.bf16.msra.mxu1 %v846_v22  ;;  %1363 = vmatpush.bf16.msra.mxu3 %v846_v22 }
 0x318   : > { %909 = vmatpush.bf16.msra.mxu1 %v845_v23  ;;  %1364 = vmatpush.bf16.msra.mxu3 %v845_v23 }
 0x31c   : > { %910 = vmatpush.bf16.msra.mxu1 %v844_v24  ;;  %1365 = vmatpush.bf16.msra.mxu3 %v844_v24 }
 0x31f   : > { %911 = vmatmul.bf16.vlgmr.msra.gmra.mxu1 %v1326_v25  ;;  %931 = vmatmul.bf16.vlgmr.msra.gmra.mxu3 %v1330_v26 }
 0x32f   : > { %916 = vmatmul.bf16.gmra.mxu1 %v1327_v27  ;;  %936 = vmatmul.bf16.gmra.mxu3 %v1331_v28 }
 0x33f   : > { %921 = vmatmul.bf16.gmra.mxu1 %v1328_v29  ;;  %941 = vmatmul.bf16.gmra.mxu3 %v1332_v30 }
 0x34f   : > { %926 = vmatmul.bf16.gmra.mxu1 %v1329_v31  ;;  %946 = vmatmul.bf16.gmra.mxu3 %v1333_v32 }
 0x39c   : > { %v912_v34 = vpop.f32.mrf.mxu1 }
 0x39d   : > { %v1862_v35 = vadd.f32 %v1448_v33, %v912_v34 }
 0x3a2   : > { %v932_v36 = vpop.f32.mrf.mxu3 }
 0x3a3   : > { %v1864_v37 = vadd.f32 %v1448_v33, %v932_v36 }
 0x3a4   : > { %v914_v38 = vpop.f32.mrf.mxu1 }
 0x3a5   : > { %v1866_v39 = vadd.f32 %v1448_v33, %v914_v38 }
 0x3aa   : > { %v934_v40 = vpop.f32.mrf.mxu3 }
 0x3ab   : > { %v1868_v41 = vadd.f32 %v1448_v33, %v934_v40 }
 0x3ac   : > { %v917_v42 = vpop.f32.mrf.mxu1 }
 0x3ad   : > { %v918_v43 = vadd.f32 %v1448_v33, %v917_v42 }
 0x3b2   : > { %v937_v44 = vpop.f32.mrf.mxu3 }
 0x3b3   : > { %v1870_v45 = vadd.f32 %v1448_v33, %v937_v44 }
 0x3b4   : > { %v919_v46 = vpop.f32.mrf.mxu1 }
 0x3b5   : > { %v920_v47 = vadd.f32 %v1448_v33, %v919_v46 }
 0x3ba   : > { %v939_v48 = vpop.f32.mrf.mxu3 }
 0x3bb   : > { %v1872_v49 = vadd.f32 %v1448_v33, %v939_v48 }
 0x3bc   : > { %v922_v50 = vpop.f32.mrf.mxu1 }
 0x3bd   : > { %v923_v51 = vadd.f32 %v1448_v33, %v922_v50 }
 0x3c2   : > { %v942_v52 = vpop.f32.mrf.mxu3 }
 0x3c3   : > { %v943_v53 = vadd.f32 %v1448_v33, %v942_v52 }
 0x3c4   : > { %v924_v54 = vpop.f32.mrf.mxu1 }
 0x3c5   : > { %v925_v55 = vadd.f32 %v1448_v33, %v924_v54 }
 0x3ca   : > { %v944_v56 = vpop.f32.mrf.mxu3 }
 0x3cb   : > { %v945_v57 = vadd.f32 %v1448_v33, %v944_v56 }
 0x3cc   : > { %v927_v58 = vpop.f32.mrf.mxu1 }
 0x3cd   : > { %v928_v59 = vadd.f32 %v1448_v33, %v927_v58 }
 0x3d2   : > { %v947_v60 = vpop.f32.mrf.mxu3 }
 0x3d3   : > { %v948_v61 = vadd.f32 %v1448_v33, %v947_v60 }
 0x3d4   : > { %v929_v62 = vpop.f32.mrf.mxu1 }
 0x3d5   : > { %v930_v63 = vadd.f32 %v1448_v33, %v929_v62 }
 0x3d7   : > { %955 = sbr.rel (%p1287_p1) target bundleno = 1006 (0x3ee), region = 80 }
 0x3da   : > { %v949_v0 = vpop.f32.mrf.mxu3 }
 0x3db   : > { %v950_v1 = vadd.f32 %v1448_v33, %v949_v0 }
 0x3dc   : > { %v956_v2 = vmax.f32 %v1862_v35, 0.0  ;;  %v957_v3 = vmax.f32 %v1866_v39, 0.0  ;;  %v958_v4 = vmax.f32 %v918_v43, 0.0  ;;  %v959_v5 = vmax.f32 %v920_v47, 0.0 }
 0x3dd   : > { %v960_v6 = vmax.f32 %v923_v51, 0.0  ;;  %v961_v7 = vmax.f32 %v925_v55, 0.0  ;;  %v962_v8 = vmax.f32 %v928_v59, 0.0  ;;  %v963_v9 = vmax.f32 %v930_v63, 0.0 }
 0x3de   : > { %972 = vst [vmem:[#allocation10] sm:$0xff] %v956_v2  ;;  %v964_v10 = vmax.f32 %v1864_v37, 0.0  ;;  %v965_v11 = vmax.f32 %v1868_v41, 0.0  ;;  %v966_v12 = vmax.f32 %v1870_v45, 0.0  ;;  %v967_v13 = vmax.f32 %v1872_v49, 0.0 }
 0x3df   : > { %973 = vst [vmem:[#allocation10 + $0x8] sm:$0xff] %v957_v3  ;;  %v968_v14 = vmax.f32 %v943_v53, 0.0  ;;  %v969_v15 = vmax.f32 %v945_v57, 0.0  ;;  %v970_v16 = vmax.f32 %v948_v61, 0.0  ;;  %v971_v17 = vmax.f32 %v950_v1, 0.0 }
 0x3e0   : > { %974 = vst [vmem:[#allocation10 + $0x10] sm:$0xff] %v958_v4 }
 0x3e1   : > { %975 = vst [vmem:[#allocation10 + $0x18] sm:$0xff] %v959_v5 }
 0x3e2   : > { %976 = vst [vmem:[#allocation10 + $0x20] sm:$0xff] %v960_v6 }
 0x3e3   : > { %977 = vst [vmem:[#allocation10 + $0x28] sm:$0xff] %v961_v7 }
 0x3e4   : > { %978 = vst [vmem:[#allocation10 + $0x30] sm:$0xff] %v962_v8 }
 0x3e5   : > { %979 = vst [vmem:[#allocation10 + $0x38] sm:$0xff] %v963_v9 }
 0x3e6   : > { %980 = vst [vmem:[#allocation10 + $0x40] sm:$0xff] %v964_v10 }
 0x3e7   : > { %981 = vst [vmem:[#allocation10 + $0x48] sm:$0xff] %v965_v11 }
 0x3e8   : > { %982 = vst [vmem:[#allocation10 + $0x50] sm:$0xff] %v966_v12 }
 0x3e9   : > { %983 = vst [vmem:[#allocation10 + $0x58] sm:$0xff] %v967_v13 }
 0x3ea   : > { %984 = vst [vmem:[#allocation10 + $0x60] sm:$0xff] %v968_v14 }
 0x3eb   : > { %985 = vst [vmem:[#allocation10 + $0x68] sm:$0xff] %v969_v15 }
 0x3ec   : > { %986 = vst [vmem:[#allocation10 + $0x70] sm:$0xff] %v970_v16 }
 0x3ed   : > { %987 = vst [vmem:[#allocation10 + $0x78] sm:$0xff] %v971_v17 }
 0x3ee PF: > { %p1288_p13 = scmp.ne.s32.totalorder %s1707_s25, 2 }
 0x3f0   : > { %991 = sbr.rel (%p1288_p13) target bundleno = 1029 (0x405), region = 84 }
 0x3f5   : > { %992 = vst [vmem:[#allocation10] sm:$0xff] %v1862_v35 }
 0x3f6   : > { %993 = vst [vmem:[#allocation10 + $0x8] sm:$0xff] %v1866_v39 }
 0x3f7   : > { %994 = vst [vmem:[#allocation10 + $0x10] sm:$0xff] %v918_v43 }
 0x3f8   : > { %995 = vst [vmem:[#allocation10 + $0x18] sm:$0xff] %v920_v47 }
 0x3f9   : > { %996 = vst [vmem:[#allocation10 + $0x20] sm:$0xff] %v923_v51 }
 0x3fa   : > { %997 = vst [vmem:[#allocation10 + $0x28] sm:$0xff] %v925_v55 }
 0x3fb   : > { %998 = vst [vmem:[#allocation10 + $0x30] sm:$0xff] %v928_v59 }
 0x3fc   : > { %999 = vst [vmem:[#allocation10 + $0x38] sm:$0xff] %v930_v63 }
 0x3fd   : > { %1000 = vst [vmem:[#allocation10 + $0x40] sm:$0xff] %v1864_v37 }
 0x3fe   : > { %1001 = vst [vmem:[#allocation10 + $0x48] sm:$0xff] %v1868_v41 }
 0x3ff   : > { %1002 = vst [vmem:[#allocation10 + $0x50] sm:$0xff] %v1870_v45 }
 0x400   : > { %1003 = vst [vmem:[#allocation10 + $0x58] sm:$0xff] %v1872_v49 }
 0x401   : > { %1004 = vst [vmem:[#allocation10 + $0x60] sm:$0xff] %v943_v53 }
 0x402   : > { %1005 = vst [vmem:[#allocation10 + $0x68] sm:$0xff] %v945_v57 }
 0x403   : > { %1006 = vst [vmem:[#allocation10 + $0x70] sm:$0xff] %v948_v61 }
 0x404   : > { %1007 = vst [vmem:[#allocation10 + $0x78] sm:$0xff] %v950_v1 }
 0x405 PF: > { %p1405_p0 = scmp.eq.s32.totalorder %s1707_s25, 2  ;;  %s1015_s24 = sshll.u32 %s1911_s6, 4  ;;  %s1016_s24 = int_to_ptr.hbm [resolvable:$true] %s1015_s24 }
 0x406   : > { %s1650_s30 = smov [#allocation10]   ;;  %s1651_s11 = smov 128  }
 0x407   : > { %s1013_s10 = sshll.u32 %s1650_s30, 4  ;;  %s1652_s12 = smov 8   ;;  %s1014_s10 = int_to_ptr.vmem [resolvable:$true] %s1013_s10 }
 0x408   : > { %1381 = dma.vmem_to_hbm [thread:$0]  (%p1405_p0), %s1014_s10, 2048, %s1016_s24, [#allocation4], %s1651_s11, %s1651_s11, %s1652_s12  }
 0x409   : > { %1626 = dma.done.wait (%p1405_p0), [#allocation4], 2048  }
 0x40a   : > { %1628 = vsyncadd (%p1405_p0), [#allocation4], 4294965248 }
 0x40b PF: > { %p19_p2 = scmp.ge.s32.totalorder %s1752_s28, 5   ;;  %s1916_s21 = smov %s1635_s22 }
 0x40c   : > { %s1917_s22 = smov %s1639_s23  ;;  %s1918_s23 = smov %s1767_s7 }
 0x40d   : > { %s1919_s24 = smov %s1752_s28  ;;  %21 = sbr.rel (!%p19_p2) target bundleno = 6 (0x6), region = 121 }
 0x412   :  { %1032 = vsyncpa [#allocation3], 1 }
 0x413   :  { %1034 = vsyncpa [#allocation3 + $0x1], 1 }
 0x414   :  { %1035 = vsyncpa [#allocation6], 1 }
 0x415   :  { %1036 = vsyncpa [#allocation9], 1 }
 0x416   :  { %1038 = vsyncpa [#allocation9 + $0x1], 1 }
 0x417   :  { %1039 = vsyncpa [#allocation4], 1 }
 0x418   :  { %1041 = vsyncpa [#allocation4 + $0x1], 1 }

</bundles_post_ra>
